<compile_context>
chip_gen: v6e
topology: v6e:2x2x1
jax: 0.10.0
libtpu: 0.0.40
codegen_flags: <defaults>
</compile_context>

<pallas_src>
import functools

import numpy as np
import jax
import jax.numpy as jnp
from jax import lax
from jax.experimental import pallas as pl
from jax.experimental.pallas import tpu as pltpu

EPS = 1e-5


# ----------------------------- host-side constants -----------------------------
@functools.lru_cache(maxsize=None)
def _conv_taps(H, W, HWp):
    """0/1 boundary masks (9, HWp) and lane-roll shifts for a 3x3 'same' conv on a
    zero-padded lane-dense (C, HWp) slab.  Tap t = (dh+1)*3 + (dw+1)."""
    HW = H * W
    n = np.arange(HWp)
    h, w = n // W, n % W
    valid_pix = n < HW
    masks, shifts = [], []
    for dh in (-1, 0, 1):
        for dw in (-1, 0, 1):
            hs, ws_ = h + dh, w + dw
            m = valid_pix & (hs >= 0) & (hs < H) & (ws_ >= 0) & (ws_ < W)
            masks.append(m.astype(np.float32))
            shifts.append(int((-(dh * W + dw)) % HWp))
    return np.stack(masks, axis=0), tuple(shifts)          # (9, HWp), 9 shifts


@functools.lru_cache(maxsize=None)
def _build_scsa_mats(H, W, ws, HWp):
    """0/1 matrices (exact in bf16); pad lanes (>= H*W) are all-zero rows/cols.
    The 1/W, 1/H, 1/ws^2 scalings are applied in f32 inside the kernel."""
    HW = H * W
    n = np.arange(HWp)
    h, w = n // W, n % W
    valid = n < HW
    m_h = ((h[:, None] == np.arange(H)[None, :]) & valid[:, None]).astype(np.float32)
    m_w = ((w[:, None] == np.arange(W)[None, :]) & valid[:, None]).astype(np.float32)
    m_hw = np.concatenate([m_h, m_w], axis=1)               # (HWp, H+W) row/col sums
    e_h = ((np.arange(H)[:, None] == h[None, :]) & valid[None, :]).astype(np.float32)
    e_w = ((np.arange(W)[:, None] == w[None, :]) & valid[None, :]).astype(np.float32)
    Hd, Wd = H // ws, W // ws
    hd, wd = h // ws, w // ws
    col = np.arange(Hd * Wd)
    pool = ((hd[:, None] == (col // Wd)[None, :]) &
            (wd[:, None] == (col % Wd)[None, :]) & valid[:, None]).astype(np.float32)
    return m_hw, e_h, e_w, pool                              # pool: (HWp, Hd*Wd)


@functools.lru_cache(maxsize=None)
def _build_group_avg(C, groups):
    gc = C // groups
    cidx = np.arange(C)
    same = (cidx[:, None] // gc) == (cidx[None, :] // gc)
    return same.astype(np.float32) / gc                      # (C, C)


def _fold_conv_bn(w, bn):
    """Fold eval-mode BatchNorm into (Cout, 9*Cin) im2col weights + (Cout, 2) scale/bias."""
    gamma, beta, mean, var = bn
    cout, cin = w.shape[0], w.shape[1]
    w_col = jnp.transpose(w, (0, 2, 3, 1)).reshape(cout, 9 * cin)   # K = tap*Cin + cin
    inv_std = 1.0 / jnp.sqrt(var + EPS)
    scale = gamma * inv_std
    bias = beta - mean * scale
    return w_col, jnp.stack([scale, bias], axis=1)                  # (Cout, 2)


# ------------------------------- fused kernel ----------------------------------
def _bottleneck_kernel(H, W, ws, shifts, head_num, head_dim, scaler,
                       use_scsa, add_residual, mm_dtype, *refs):
    if use_scsa:
        (x_ref, mask_ref, w1_ref, bn1_ref, mhw_ref, eh_ref, ew_ref,
         dwcw_ref, vec_ref, gavg_ref, pool_ref, w2_ref, bn2_ref, o_ref) = refs
    else:
        (x_ref, mask_ref, w1_ref, bn1_ref, w2_ref, bn2_ref, o_ref) = refs

    x = x_ref[0]                                                   # (C1, HWp), pad lanes = 0
    masks = mask_ref[...]                                          # (9, HWp) 0/1

    def conv3x3_bn_silu(inp, w_ref, bn_ref):
        # im2col via lane rotations (XLU) + boundary masks (VPU), then ONE matmul
        # with K = 9*Cin against the folded conv weights (bf16 operands, f32 acc).
        taps = []
        for t in range(9):
            s = shifts[t]
            r = inp if s == 0 else pltpu.roll(inp, s, 1)
            taps.append(r * masks[t:t + 1, :])
        col = jnp.concatenate(taps, axis=0)                        # (9*Cin, HWp)
        y = jnp.dot(w_ref[...].astype(mm_dtype), col.astype(mm_dtype),
                    preferred_element_type=jnp.float32)            # (Cout, HWp)
        bn = bn_ref[...]
        y = y * bn[:, 0:1] + bn[:, 1:2]                            # folded BN (eval)
        return y * jax.nn.sigmoid(y)                               # SiLU

    y1 = conv3x3_bn_silu(x, w1_ref, bn1_ref)                       # (C_, HWp)

    if use_scsa:
        C = y1.shape[0]
        vecs = vec_ref[...]                                        # (C, 10) packed params
        dwc_b = vecs[:, 0:1]
        gnh_g, gnh_b = vecs[:, 1:2], vecs[:, 2:3]
        gnw_g, gnw_b = vecs[:, 3:4], vecs[:, 4:5]
        gn1_g, gn1_b = vecs[:, 5:6], vecs[:, 6:7]
        wq, wk, wv = vecs[:, 7:8], vecs[:, 8:9], vecs[:, 9:10]
        dwcw = dwcw_ref[...]                                       # (C, 9)
        gavg = gavg_ref[...]                                       # (C, C) 1/gc within group

        def dwc_gn_sig(feat, gamma, beta):                         # feat: (C, L), f32
            L = feat.shape[1]
            z = jnp.zeros((C, 4), jnp.float32)
            featp = jnp.concatenate([z, feat, z], axis=1)          # zero-extended
            acc = dwc_b + jnp.zeros((C, L), jnp.float32)
            for t in range(9):                                     # static lane slices + FMA
                acc = acc + dwcw[:, t:t + 1] * featp[:, t:t + L]
            # GroupNorm(4, C) via masked group reductions (no cross-group reshape)
            mu = jnp.dot(gavg, jnp.sum(acc, axis=1, keepdims=True),
                         preferred_element_type=jnp.float32) * (1.0 / L)
            d = acc - mu
            var = jnp.dot(gavg, jnp.sum(d * d, axis=1, keepdims=True),
                          preferred_element_type=jnp.float32) * (1.0 / L)
            return jax.nn.sigmoid(d * lax.rsqrt(var + EPS) * gamma + beta)

        # H- and W- sums in one matmul (0/1 RHS), scaled to means in f32
        xhw = jnp.dot(y1.astype(mm_dtype), mhw_ref[...].astype(mm_dtype),
                      preferred_element_type=jnp.float32)          # (C, H+W)
        h_attn = dwc_gn_sig(xhw[:, :H] * (1.0 / W), gnh_g, gnh_b)  # (C, H)
        w_attn = dwc_gn_sig(xhw[:, H:H + W] * (1.0 / H), gnw_g, gnw_b)
        # broadcast the two 1-D gates back to pixels with expansion matmuls
        hexp = jnp.dot(h_attn.astype(mm_dtype), eh_ref[...].astype(mm_dtype),
                       preferred_element_type=jnp.float32)         # (C, HWp)
        wexp = jnp.dot(w_attn.astype(mm_dtype), ew_ref[...].astype(mm_dtype),
                       preferred_element_type=jnp.float32)
        x_mod = y1 * hexp * wexp                                   # pad lanes -> 0

        # ws x ws average pooling as one matmul (0/1 RHS), scaled in f32
        y = jnp.dot(x_mod.astype(mm_dtype), pool_ref[...].astype(mm_dtype),
                    preferred_element_type=jnp.float32) * (1.0 / (ws * ws))  # (C, Np)
        # GroupNorm(1, C)
        mu = jnp.mean(y, keepdims=True)
        d = y - mu
        var = jnp.mean(d * d, keepdims=True)
        yn = d * lax.rsqrt(var + EPS) * gn1_g + gn1_b

        # q/k/v: 1x1 depthwise (groups=dim, no bias) -> per-channel scaling (f32)
        q, k, v = yn * wq, yn * wk, yn * wv                        # (C, Np)
        if head_num == 1:
            attn = jnp.dot(q, k.T, preferred_element_type=jnp.float32) * scaler
            attn = jax.nn.softmax(attn, axis=-1)
            o = jnp.dot(attn, v, preferred_element_type=jnp.float32)
            ca = jnp.mean(o, axis=1, keepdims=True)
        else:
            Np = q.shape[1]
            q3 = q.reshape(head_num, head_dim, Np)
            k3 = k.reshape(head_num, head_dim, Np)
            v3 = v.reshape(head_num, head_dim, Np)
            attn = jnp.einsum('hdn,hen->hde', q3, k3,
                              preferred_element_type=jnp.float32) * scaler
            attn = jax.nn.softmax(attn, axis=-1)
            o3 = jnp.einsum('hde,hen->hdn', attn, v3,
                            preferred_element_type=jnp.float32)
            ca = jnp.mean(o3.reshape(C, Np), axis=1, keepdims=True)
        ca = jax.nn.sigmoid(ca)                                    # (C, 1)
        y1 = x_mod * ca

    out = conv3x3_bn_silu(y1, w2_ref, bn2_ref)                     # (C2, HWp)
    if add_residual:
        out = out + x
    o_ref[0] = out.astype(o_ref.dtype)                             # lane-dense store


# --------------------------------- wrapper --------------------------------------
def bottleneck_forward(x, p, c1, c2, shortcut=True, e=0.5, window_size=7,
                       mm_dtype=jnp.bfloat16):
    """Fused Bottleneck_1 forward.  mm_dtype controls MXU operand precision
    (bf16 default, f32 accumulation); pass jnp.float32 for bit-tight parity."""
    B, _, H, W = x.shape
    c_ = int(c2 * e)
    add = shortcut and (c1 == c2)
    use_scsa = not add
    head_num = max(c_ // 64, 1)
    head_dim = c_ // head_num
    scaler = float(head_dim) ** -0.5
    HW = H * W
    HWp = max(128, pl.cdiv(HW, 128) * 128)                         # lane-dense padded width
    ws = window_size
    Np = (H // ws) * (W // ws)

    masks, shifts = _conv_taps(H, W, HWp)                          # cached numpy constants
    w1_col, bn1 = _fold_conv_bn(p['cv1_w'], p['cv1_bn'])
    w2_col, bn2 = _fold_conv_bn(p['cv2_w'], p['cv2_bn'])

    x_flat = jnp.pad(x.reshape(B, c1, HW), ((0, 0), (0, 0), (0, HWp - HW)))

    def rep(shape):
        return pl.BlockSpec(shape, lambda b, _nd=len(shape): (0,) * _nd)

    in_specs = [pl.BlockSpec((1, c1, HWp), lambda b: (b, 0, 0)),
                rep((9, HWp)), rep((c_, 9 * c1)), rep((c_, 2))]
    args = [x_flat, masks, w1_col, bn1]
    if use_scsa:
        m_hw, e_h, e_w, pool = _build_scsa_mats(H, W, ws, HWp)
        gavg = _build_group_avg(c_, 4)
        vecs = jnp.concatenate([p['dwc_b'], p['gnh_g'], p['gnh_b'],
                                p['gnw_g'], p['gnw_b'], p['gn1_g'], p['gn1_b'],
                                p['wq'], p['wk'], p['wv']], axis=1)  # (c_, 10)
        in_specs += [rep((HWp, H + W)), rep((H, HWp)), rep((W, HWp)),
                     rep((c_, 9)), rep((c_, 10)), rep((c_, c_)), rep((HWp, Np))]
        args += [m_hw, e_h, e_w, p['dwc_w'], vecs, gavg, pool]
    in_specs += [rep((c2, 9 * c_)), rep((c2, 2))]
    args += [w2_col, bn2]

    kern = functools.partial(_bottleneck_kernel, H, W, ws, shifts,
                             head_num, head_dim, scaler, use_scsa, add, mm_dtype)

    out_flat = pl.pallas_call(
        kern,
        out_shape=jax.ShapeDtypeStruct((B, c2, HWp), x.dtype),
        grid=(B,),
        in_specs=in_specs,
        out_specs=pl.BlockSpec((1, c2, HWp), lambda b: (b, 0, 0)),
        compiler_params=pltpu.CompilerParams(
            dimension_semantics=("parallel",),        # batch split across TCs (v7x)
            vmem_limit_bytes=32 * 1024 * 1024),       # explicit, fits all generations
    )(*args)

    return out_flat[:, :, :HW].reshape(B, c2, H, W)


# --------------------------- parameter initialization ---------------------------
def init_params(key, c1, c2, e=0.5):
    c_ = int(c2 * e)
    ks = iter(jax.random.split(key, 32))

    def nrm(shape, s=0.1):
        return jax.random.normal(next(ks), shape, jnp.float32) * s

    def pos(shape):
        return jax.random.uniform(next(ks), shape, jnp.float32, 0.5, 1.5)

    p = {}
    p['cv1_w'] = nrm((c_, c1, 3, 3), 0.2)
    p['cv1_bn'] = (pos((c_,)), nrm((c_,)), nrm((c_,)), pos((c_,)))   # gamma, beta, mean, var
    p['cv2_w'] = nrm((c2, c_, 3, 3), 0.2)
    p['cv2_bn'] = (pos((c2,)), nrm((c2,)), nrm((c2,)), pos((c2,)))

    # SCSA(dim=c_): 4 depthwise conv1d groups (k = 3,5,7,9), packed to width 9 (centered)
    gc = c_ // 4
    dwc_w = jnp.zeros((c_, 9), jnp.float32)
    dwc_b = jnp.zeros((c_,), jnp.float32)
    for gi, kk in enumerate([3, 5, 7, 9]):
        wg = nrm((gc, kk), 0.3)
        bg = nrm((gc,), 0.1)
        off = (9 - kk) // 2
        dwc_w = dwc_w.at[gi * gc:(gi + 1) * gc, off:off + kk].set(wg)
        dwc_b = dwc_b.at[gi * gc:(gi + 1) * gc].set(bg)
    p['dwc_w'] = dwc_w
    p['dwc_b'] = dwc_b.reshape(c_, 1)
    p['gnh_g'] = pos((c_,)).reshape(c_, 1); p['gnh_b'] = nrm((c_,)).reshape(c_, 1)
    p['gnw_g'] = pos((c_,)).reshape(c_, 1); p['gnw_b'] = nrm((c_,)).reshape(c_, 1)
    p['gn1_g'] = pos((c_,)).reshape(c_, 1); p['gn1_b'] = nrm((c_,)).reshape(c_, 1)
    p['wq'] = nrm((c_,), 0.5).reshape(c_, 1)
    p['wk'] = nrm((c_,), 0.5).reshape(c_, 1)
    p['wv'] = nrm((c_,), 0.5).reshape(c_, 1)
    return p


# --------------------------- pure-JAX reference (check) -------------------------
def _ref_conv(x, w, gamma, beta, mean, var):
    y = lax.conv_general_dilated(x, w, (1, 1), [(1, 1), (1, 1)],
                                 dimension_numbers=('NCHW', 'OIHW', 'NCHW'))
    y = (y - mean[None, :, None, None]) / jnp.sqrt(var + EPS)[None, :, None, None]
    y = y * gamma[None, :, None, None] + beta[None, :, None, None]
    return y * jax.nn.sigmoid(y)


def _ref_scsa(x, p, head_num, head_dim, ws=7):
    B, C, H, W = x.shape

    def dwc(feat):
        w9 = p['dwc_w'].reshape(C, 1, 9)
        out = lax.conv_general_dilated(feat, w9, (1,), [(4, 4)],
                                       dimension_numbers=('NCH', 'OIH', 'NCH'),
                                       feature_group_count=C)
        return out + p['dwc_b'].reshape(1, C, 1)

    def gn(feat, g, gamma, beta):
        B_, C_, L_ = feat.shape
        grp = feat.reshape(B_, g, (C_ // g) * L_)
        mu = grp.mean(axis=2, keepdims=True)
        var = ((grp - mu) ** 2).mean(axis=2, keepdims=True)
        out = ((grp - mu) / jnp.sqrt(var + EPS)).reshape(B_, C_, L_)
        return out * gamma.reshape(1, C_, 1) + beta.reshape(1, C_, 1)

    x_h = x.mean(axis=3)
    x_w = x.mean(axis=2)
    h_attn = jax.nn.sigmoid(gn(dwc(x_h), 4, p['gnh_g'][:, 0], p['gnh_b'][:, 0]))
    w_attn = jax.nn.sigmoid(gn(dwc(x_w), 4, p['gnw_g'][:, 0], p['gnw_b'][:, 0]))
    xm = x * h_attn[:, :, :, None] * w_attn[:, :, None, :]
    Hd, Wd = H // ws, W // ws
    y = xm.reshape(B, C, Hd, ws, Wd, ws).mean(axis=(3, 5)).reshape(B, C, Hd * Wd)
    yn = gn(y, 1, p['gn1_g'][:, 0], p['gn1_b'][:, 0])
    q = (yn * p['wq'].reshape(1, C, 1)).reshape(B, head_num, head_dim, Hd * Wd)
    k = (yn * p['wk'].reshape(1, C, 1)).reshape(B, head_num, head_dim, Hd * Wd)
    v = (yn * p['wv'].reshape(1, C, 1)).reshape(B, head_num, head_dim, Hd * Wd)
    attn = jnp.einsum('bhdn,bhen->bhde', q, k) * (head_dim ** -0.5)
    attn = jax.nn.softmax(attn, axis=-1)
    out = jnp.einsum('bhde,bhen->bhdn', attn, v)
    ca = jax.nn.sigmoid(out.mean(axis=3).reshape(B, C, 1, 1))
    return ca * xm


def _ref_bottleneck(x, p, c1, c2, shortcut=True, e=0.5):
    c_ = int(c2 * e)
    add = shortcut and c1 == c2
    y1 = _ref_conv(x, p['cv1_w'], *p['cv1_bn'])
    if add:
        return x + _ref_conv(y1, p['cv2_w'], *p['cv2_bn'])
    head_num = max(c_ // 64, 1)
    head_dim = c_ // head_num
    ya = _ref_scsa(y1, p, head_num, head_dim, 7)
    return _ref_conv(ya, p['cv2_w'], *p['cv2_bn'])


# ------------------------------------ main ---------------------------------------
if __name__ == "__main__":
    key = jax.random.PRNGKey(0)
    kx, kp, kx2, kp2 = jax.random.split(key, 4)

    fwd = jax.jit(bottleneck_forward,
                  static_argnames=("c1", "c2", "shortcut", "e", "window_size", "mm_dtype"))

    # 1) c1 != c2 -> SCSA attention branch of Bottleneck_1 is exercised.
    B, C1, C2, H, W = 2, 8, 16, 14, 14            # H, W divisible by window_size=7
    x = jax.random.normal(kx, (B, C1, H, W), jnp.float32)
    params = init_params(kp, C1, C2)
    ref = _ref_bottleneck(x, params, C1, C2)

    # 1a) f32 MXU operands: bit-tight check vs the pure-JAX reference.
    out = jax.block_until_ready(fwd(x, params, c1=C1, c2=C2, mm_dtype=jnp.float32))
    assert out.shape == (B, C2, H, W)
    err = float(jnp.max(jnp.abs(out - ref)))
    if not jnp.allclose(out, ref, atol=2e-3, rtol=2e-3):
        raise AssertionError(f"SCSA branch (f32) mismatch vs reference, max abs err = {err}")

    # 1b) default bf16 MXU operands (f32 accumulation): scale-aware sanity check.
    out_bf = jax.block_until_ready(fwd(x, params, c1=C1, c2=C2))
    rel_bf = float(jnp.max(jnp.abs(out_bf - ref)) / jnp.max(jnp.abs(ref)))
    if rel_bf > 2e-2:
        raise AssertionError(f"SCSA branch (bf16) mismatch vs reference, rel err = {rel_bf}")

    # 2) c1 == c2 -> shortcut (residual) branch, f32 tight.
    C1b = C2b = 16
    x2 = jax.random.normal(kx2, (B, C1b, H, W), jnp.float32)
    params2 = init_params(kp2, C1b, C2b)
    out2 = jax.block_until_ready(fwd(x2, params2, c1=C1b, c2=C2b, mm_dtype=jnp.float32))
    ref2 = _ref_bottleneck(x2, params2, C1b, C2b)
    err2 = float(jnp.max(jnp.abs(out2 - ref2)))
    if not jnp.allclose(out2, ref2, atol=2e-3, rtol=2e-3):
        raise AssertionError(f"residual branch mismatch vs reference, max abs err = {err2}")

    print("KERNEL_OK")
</pallas_src>

<mosaic_0001>
module attributes {stable_mosaic.version = 11 : i64} {
  func.func @_bottleneck_kernel(%arg0: i32, %arg1: memref<1x8x256xf32, #tpu.memory_space<vmem>>, %arg2: memref<9x256xf32, #tpu.memory_space<vmem>>, %arg3: memref<8x72xf32, #tpu.memory_space<vmem>>, %arg4: memref<8x2xf32, #tpu.memory_space<vmem>>, %arg5: memref<256x28xf32, #tpu.memory_space<vmem>>, %arg6: memref<14x256xf32, #tpu.memory_space<vmem>>, %arg7: memref<14x256xf32, #tpu.memory_space<vmem>>, %arg8: memref<8x9xf32, #tpu.memory_space<vmem>>, %arg9: memref<8x10xf32, #tpu.memory_space<vmem>>, %arg10: memref<8x8xf32, #tpu.memory_space<vmem>>, %arg11: memref<256x4xf32, #tpu.memory_space<vmem>>, %arg12: memref<16x72xf32, #tpu.memory_space<vmem>>, %arg13: memref<16x2xf32, #tpu.memory_space<vmem>>, %arg14: memref<1x16x256xf32, #tpu.memory_space<vmem>>) attributes {dimension_semantics = [#tpu.dimension_semantics<parallel>], iteration_bounds = array<i64: 2>, scalar_prefetch = 0 : i64, scratch_operands = 0 : i64, tpu.core_type = #tpu.core_type<tc>, window_params = [{transform_indices = @transform_0, window_bounds = array<i64: 1, 8, 256>}, {pipeline_mode = #tpu.pipeline_mode<synchronous>, transform_indices = @transform_1, window_bounds = array<i64: 9, 256>}, {pipeline_mode = #tpu.pipeline_mode<synchronous>, transform_indices = @transform_2, window_bounds = array<i64: 8, 72>}, {pipeline_mode = #tpu.pipeline_mode<synchronous>, transform_indices = @transform_3, window_bounds = array<i64: 8, 2>}, {pipeline_mode = #tpu.pipeline_mode<synchronous>, transform_indices = @transform_4, window_bounds = array<i64: 256, 28>}, {pipeline_mode = #tpu.pipeline_mode<synchronous>, transform_indices = @transform_5, window_bounds = array<i64: 14, 256>}, {pipeline_mode = #tpu.pipeline_mode<synchronous>, transform_indices = @transform_6, window_bounds = array<i64: 14, 256>}, {pipeline_mode = #tpu.pipeline_mode<synchronous>, transform_indices = @transform_7, window_bounds = array<i64: 8, 9>}, {pipeline_mode = #tpu.pipeline_mode<synchronous>, transform_indices = @transform_8, window_bounds = array<i64: 8, 10>}, {pipeline_mode = #tpu.pipeline_mode<synchronous>, transform_indices = @transform_9, window_bounds = array<i64: 8, 8>}, {pipeline_mode = #tpu.pipeline_mode<synchronous>, transform_indices = @transform_10, window_bounds = array<i64: 256, 4>}, {pipeline_mode = #tpu.pipeline_mode<synchronous>, transform_indices = @transform_11, window_bounds = array<i64: 16, 72>}, {pipeline_mode = #tpu.pipeline_mode<synchronous>, transform_indices = @transform_12, window_bounds = array<i64: 16, 2>}, {transform_indices = @transform_13, window_bounds = array<i64: 1, 16, 256>}]} {
    %c0 = arith.constant 0 : index
    %c0_0 = arith.constant 0 : index
    %c0_1 = arith.constant 0 : index
    %0 = vector.load %arg1[%c0, %c0_0, %c0_1] : memref<1x8x256xf32, #tpu.memory_space<vmem>>, vector<1x8x256xf32>
    %1 = vector.shape_cast %0 : vector<1x8x256xf32> to vector<8x256xf32>
    %c0_2 = arith.constant 0 : index
    %c0_3 = arith.constant 0 : index
    %2 = vector.load %arg2[%c0_2, %c0_3] : memref<9x256xf32, #tpu.memory_space<vmem>>, vector<9x256xf32>
    %c15_i32 = arith.constant 15 : i32
    %3 = tpu.dynamic_rotate %1 by %c15_i32 dim 1 : vector<8x256xf32>, i32 -> vector<8x256xf32>
    %4 = vector.extract_strided_slice %2 {offsets = [0, 0], sizes = [1, 256], strides = [1, 1]} : vector<9x256xf32> to vector<1x256xf32>
    %5 = vector.broadcast %4 : vector<1x256xf32> to vector<8x256xf32>
    %6 = arith.mulf %3, %5 : vector<8x256xf32>
    %c14_i32 = arith.constant 14 : i32
    %7 = tpu.dynamic_rotate %1 by %c14_i32 dim 1 : vector<8x256xf32>, i32 -> vector<8x256xf32>
    %8 = vector.extract_strided_slice %2 {offsets = [1, 0], sizes = [1, 256], strides = [1, 1]} : vector<9x256xf32> to vector<1x256xf32>
    %9 = vector.broadcast %8 : vector<1x256xf32> to vector<8x256xf32>
    %10 = arith.mulf %7, %9 : vector<8x256xf32>
    %c13_i32 = arith.constant 13 : i32
    %11 = tpu.dynamic_rotate %1 by %c13_i32 dim 1 : vector<8x256xf32>, i32 -> vector<8x256xf32>
    %12 = vector.extract_strided_slice %2 {offsets = [2, 0], sizes = [1, 256], strides = [1, 1]} : vector<9x256xf32> to vector<1x256xf32>
    %13 = vector.broadcast %12 : vector<1x256xf32> to vector<8x256xf32>
    %14 = arith.mulf %11, %13 : vector<8x256xf32>
    %c1_i32 = arith.constant 1 : i32
    %15 = tpu.dynamic_rotate %1 by %c1_i32 dim 1 : vector<8x256xf32>, i32 -> vector<8x256xf32>
    %16 = vector.extract_strided_slice %2 {offsets = [3, 0], sizes = [1, 256], strides = [1, 1]} : vector<9x256xf32> to vector<1x256xf32>
    %17 = vector.broadcast %16 : vector<1x256xf32> to vector<8x256xf32>
    %18 = arith.mulf %15, %17 : vector<8x256xf32>
    %19 = vector.extract_strided_slice %2 {offsets = [4, 0], sizes = [1, 256], strides = [1, 1]} : vector<9x256xf32> to vector<1x256xf32>
    %20 = vector.broadcast %19 : vector<1x256xf32> to vector<8x256xf32>
    %21 = arith.mulf %1, %20 : vector<8x256xf32>
    %c255_i32 = arith.constant 255 : i32
    %22 = tpu.dynamic_rotate %1 by %c255_i32 dim 1 : vector<8x256xf32>, i32 -> vector<8x256xf32>
    %23 = vector.extract_strided_slice %2 {offsets = [5, 0], sizes = [1, 256], strides = [1, 1]} : vector<9x256xf32> to vector<1x256xf32>
    %24 = vector.broadcast %23 : vector<1x256xf32> to vector<8x256xf32>
    %25 = arith.mulf %22, %24 : vector<8x256xf32>
    %c243_i32 = arith.constant 243 : i32
    %26 = tpu.dynamic_rotate %1 by %c243_i32 dim 1 : vector<8x256xf32>, i32 -> vector<8x256xf32>
    %27 = vector.extract_strided_slice %2 {offsets = [6, 0], sizes = [1, 256], strides = [1, 1]} : vector<9x256xf32> to vector<1x256xf32>
    %28 = vector.broadcast %27 : vector<1x256xf32> to vector<8x256xf32>
    %29 = arith.mulf %26, %28 : vector<8x256xf32>
    %c242_i32 = arith.constant 242 : i32
    %30 = tpu.dynamic_rotate %1 by %c242_i32 dim 1 : vector<8x256xf32>, i32 -> vector<8x256xf32>
    %31 = vector.extract_strided_slice %2 {offsets = [7, 0], sizes = [1, 256], strides = [1, 1]} : vector<9x256xf32> to vector<1x256xf32>
    %32 = vector.broadcast %31 : vector<1x256xf32> to vector<8x256xf32>
    %33 = arith.mulf %30, %32 : vector<8x256xf32>
    %c241_i32 = arith.constant 241 : i32
    %34 = tpu.dynamic_rotate %1 by %c241_i32 dim 1 : vector<8x256xf32>, i32 -> vector<8x256xf32>
    %35 = vector.extract_strided_slice %2 {offsets = [8, 0], sizes = [1, 256], strides = [1, 1]} : vector<9x256xf32> to vector<1x256xf32>
    %36 = vector.broadcast %35 : vector<1x256xf32> to vector<8x256xf32>
    %37 = arith.mulf %34, %36 : vector<8x256xf32>
    %38 = tpu.concatenate %6, %10, %14, %18, %21, %25, %29, %33, %37 in 0 : vector<8x256xf32>, vector<8x256xf32>, vector<8x256xf32>, vector<8x256xf32>, vector<8x256xf32>, vector<8x256xf32>, vector<8x256xf32>, vector<8x256xf32>, vector<8x256xf32> -> vector<72x256xf32>
    %c0_4 = arith.constant 0 : index
    %c0_5 = arith.constant 0 : index
    %39 = vector.load %arg3[%c0_4, %c0_5] : memref<8x72xf32, #tpu.memory_space<vmem>>, vector<8x72xf32>
    %cst = arith.constant dense<0.000000e+00> : vector<8x256xf32>
    %40 = tpu.matmul %39, %38, %cst {dimension_numbers = #tpu.dot_dimension_numbers<[1], [0], [0], [1], [0, 0, 1, 1], [], []>} : vector<8x72xf32>, vector<72x256xf32>, vector<8x256xf32> -> vector<8x256xf32>
    %c0_6 = arith.constant 0 : index
    %c0_7 = arith.constant 0 : index
    %41 = vector.load %arg4[%c0_6, %c0_7] : memref<8x2xf32, #tpu.memory_space<vmem>>, vector<8x2xf32>
    %42 = vector.extract_strided_slice %41 {offsets = [0, 0], sizes = [8, 1], strides = [1, 1]} : vector<8x2xf32> to vector<8x1xf32>
    %43 = vector.broadcast %42 : vector<8x1xf32> to vector<8x256xf32>
    %44 = arith.mulf %40, %43 : vector<8x256xf32>
    %45 = vector.extract_strided_slice %41 {offsets = [0, 1], sizes = [8, 1], strides = [1, 1]} : vector<8x2xf32> to vector<8x1xf32>
    %46 = vector.broadcast %45 : vector<8x1xf32> to vector<8x256xf32>
    %47 = arith.addf %44, %46 : vector<8x256xf32>
    %48 = arith.negf %47 : vector<8x256xf32>
    %49 = math.exp %48 : vector<8x256xf32>
    %cst_8 = arith.constant 1.000000e+00 : f32
    %50 = vector.broadcast %cst_8 : f32 to vector<8x256xf32>
    %51 = arith.addf %50, %49 : vector<8x256xf32>
    %52 = arith.divf %50, %51 : vector<8x256xf32>
    %53 = arith.mulf %47, %52 : vector<8x256xf32>
    %c0_9 = arith.constant 0 : index
    %c0_10 = arith.constant 0 : index
    %54 = vector.load %arg9[%c0_9, %c0_10] : memref<8x10xf32, #tpu.memory_space<vmem>>, vector<8x10xf32>
    %55 = vector.extract_strided_slice %54 {offsets = [0, 0], sizes = [8, 1], strides = [1, 1]} : vector<8x10xf32> to vector<8x1xf32>
    %56 = vector.extract_strided_slice %54 {offsets = [0, 1], sizes = [8, 1], strides = [1, 1]} : vector<8x10xf32> to vector<8x1xf32>
    %57 = vector.extract_strided_slice %54 {offsets = [0, 2], sizes = [8, 1], strides = [1, 1]} : vector<8x10xf32> to vector<8x1xf32>
    %58 = vector.extract_strided_slice %54 {offsets = [0, 3], sizes = [8, 1], strides = [1, 1]} : vector<8x10xf32> to vector<8x1xf32>
    %59 = vector.extract_strided_slice %54 {offsets = [0, 4], sizes = [8, 1], strides = [1, 1]} : vector<8x10xf32> to vector<8x1xf32>
    %60 = vector.extract_strided_slice %54 {offsets = [0, 5], sizes = [8, 1], strides = [1, 1]} : vector<8x10xf32> to vector<8x1xf32>
    %61 = vector.extract_strided_slice %54 {offsets = [0, 6], sizes = [8, 1], strides = [1, 1]} : vector<8x10xf32> to vector<8x1xf32>
    %62 = vector.extract_strided_slice %54 {offsets = [0, 7], sizes = [8, 1], strides = [1, 1]} : vector<8x10xf32> to vector<8x1xf32>
    %63 = vector.extract_strided_slice %54 {offsets = [0, 8], sizes = [8, 1], strides = [1, 1]} : vector<8x10xf32> to vector<8x1xf32>
    %64 = vector.extract_strided_slice %54 {offsets = [0, 9], sizes = [8, 1], strides = [1, 1]} : vector<8x10xf32> to vector<8x1xf32>
    %c0_11 = arith.constant 0 : index
    %c0_12 = arith.constant 0 : index
    %65 = vector.load %arg8[%c0_11, %c0_12] : memref<8x9xf32, #tpu.memory_space<vmem>>, vector<8x9xf32>
    %c0_13 = arith.constant 0 : index
    %c0_14 = arith.constant 0 : index
    %66 = vector.load %arg10[%c0_13, %c0_14] : memref<8x8xf32, #tpu.memory_space<vmem>>, vector<8x8xf32>
    %c0_15 = arith.constant 0 : index
    %c0_16 = arith.constant 0 : index
    %67 = vector.load %arg5[%c0_15, %c0_16] : memref<256x28xf32, #tpu.memory_space<vmem>>, vector<256x28xf32>
    %cst_17 = arith.constant dense<0.000000e+00> : vector<8x28xf32>
    %68 = tpu.matmul %53, %67, %cst_17 {dimension_numbers = #tpu.dot_dimension_numbers<[1], [0], [0], [1], [0, 0, 1, 1], [], []>} : vector<8x256xf32>, vector<256x28xf32>, vector<8x28xf32> -> vector<8x28xf32>
    %69 = vector.extract_strided_slice %68 {offsets = [0, 0], sizes = [8, 14], strides = [1, 1]} : vector<8x28xf32> to vector<8x14xf32>
    %cst_18 = arith.constant 0.0714285746 : f32
    %70 = vector.broadcast %cst_18 : f32 to vector<8x14xf32>
    %71 = arith.mulf %69, %70 : vector<8x14xf32>
    %cst_19 = arith.constant 0.000000e+00 : f32
    %72 = vector.broadcast %cst_19 : f32 to vector<8x4xf32>
    %73 = tpu.concatenate %72, %71, %72 in 1 : vector<8x4xf32>, vector<8x14xf32>, vector<8x4xf32> -> vector<8x22xf32>
    %cst_20 = arith.constant 0.000000e+00 : f32
    %74 = vector.broadcast %cst_20 : f32 to vector<8x14xf32>
    %75 = vector.broadcast %55 : vector<8x1xf32> to vector<8x14xf32>
    %76 = arith.addf %75, %74 : vector<8x14xf32>
    %77 = vector.extract_strided_slice %65 {offsets = [0, 0], sizes = [8, 1], strides = [1, 1]} : vector<8x9xf32> to vector<8x1xf32>
    %78 = vector.extract_strided_slice %73 {offsets = [0, 0], sizes = [8, 14], strides = [1, 1]} : vector<8x22xf32> to vector<8x14xf32>
    %79 = vector.broadcast %77 : vector<8x1xf32> to vector<8x14xf32>
    %80 = arith.mulf %79, %78 : vector<8x14xf32>
    %81 = arith.addf %76, %80 : vector<8x14xf32>
    %82 = vector.extract_strided_slice %65 {offsets = [0, 1], sizes = [8, 1], strides = [1, 1]} : vector<8x9xf32> to vector<8x1xf32>
    %83 = vector.extract_strided_slice %73 {offsets = [0, 1], sizes = [8, 14], strides = [1, 1]} : vector<8x22xf32> to vector<8x14xf32>
    %84 = vector.broadcast %82 : vector<8x1xf32> to vector<8x14xf32>
    %85 = arith.mulf %84, %83 : vector<8x14xf32>
    %86 = arith.addf %81, %85 : vector<8x14xf32>
    %87 = vector.extract_strided_slice %65 {offsets = [0, 2], sizes = [8, 1], strides = [1, 1]} : vector<8x9xf32> to vector<8x1xf32>
    %88 = vector.extract_strided_slice %73 {offsets = [0, 2], sizes = [8, 14], strides = [1, 1]} : vector<8x22xf32> to vector<8x14xf32>
    %89 = vector.broadcast %87 : vector<8x1xf32> to vector<8x14xf32>
    %90 = arith.mulf %89, %88 : vector<8x14xf32>
    %91 = arith.addf %86, %90 : vector<8x14xf32>
    %92 = vector.extract_strided_slice %65 {offsets = [0, 3], sizes = [8, 1], strides = [1, 1]} : vector<8x9xf32> to vector<8x1xf32>
    %93 = vector.extract_strided_slice %73 {offsets = [0, 3], sizes = [8, 14], strides = [1, 1]} : vector<8x22xf32> to vector<8x14xf32>
    %94 = vector.broadcast %92 : vector<8x1xf32> to vector<8x14xf32>
    %95 = arith.mulf %94, %93 : vector<8x14xf32>
    %96 = arith.addf %91, %95 : vector<8x14xf32>
    %97 = vector.extract_strided_slice %65 {offsets = [0, 4], sizes = [8, 1], strides = [1, 1]} : vector<8x9xf32> to vector<8x1xf32>
    %98 = vector.extract_strided_slice %73 {offsets = [0, 4], sizes = [8, 14], strides = [1, 1]} : vector<8x22xf32> to vector<8x14xf32>
    %99 = vector.broadcast %97 : vector<8x1xf32> to vector<8x14xf32>
    %100 = arith.mulf %99, %98 : vector<8x14xf32>
    %101 = arith.addf %96, %100 : vector<8x14xf32>
    %102 = vector.extract_strided_slice %65 {offsets = [0, 5], sizes = [8, 1], strides = [1, 1]} : vector<8x9xf32> to vector<8x1xf32>
    %103 = vector.extract_strided_slice %73 {offsets = [0, 5], sizes = [8, 14], strides = [1, 1]} : vector<8x22xf32> to vector<8x14xf32>
    %104 = vector.broadcast %102 : vector<8x1xf32> to vector<8x14xf32>
    %105 = arith.mulf %104, %103 : vector<8x14xf32>
    %106 = arith.addf %101, %105 : vector<8x14xf32>
    %107 = vector.extract_strided_slice %65 {offsets = [0, 6], sizes = [8, 1], strides = [1, 1]} : vector<8x9xf32> to vector<8x1xf32>
    %108 = vector.extract_strided_slice %73 {offsets = [0, 6], sizes = [8, 14], strides = [1, 1]} : vector<8x22xf32> to vector<8x14xf32>
    %109 = vector.broadcast %107 : vector<8x1xf32> to vector<8x14xf32>
    %110 = arith.mulf %109, %108 : vector<8x14xf32>
    %111 = arith.addf %106, %110 : vector<8x14xf32>
    %112 = vector.extract_strided_slice %65 {offsets = [0, 7], sizes = [8, 1], strides = [1, 1]} : vector<8x9xf32> to vector<8x1xf32>
    %113 = vector.extract_strided_slice %73 {offsets = [0, 7], sizes = [8, 14], strides = [1, 1]} : vector<8x22xf32> to vector<8x14xf32>
    %114 = vector.broadcast %112 : vector<8x1xf32> to vector<8x14xf32>
    %115 = arith.mulf %114, %113 : vector<8x14xf32>
    %116 = arith.addf %111, %115 : vector<8x14xf32>
    %117 = vector.extract_strided_slice %65 {offsets = [0, 8], sizes = [8, 1], strides = [1, 1]} : vector<8x9xf32> to vector<8x1xf32>
    %118 = vector.extract_strided_slice %73 {offsets = [0, 8], sizes = [8, 14], strides = [1, 1]} : vector<8x22xf32> to vector<8x14xf32>
    %119 = vector.broadcast %117 : vector<8x1xf32> to vector<8x14xf32>
    %120 = arith.mulf %119, %118 : vector<8x14xf32>
    %121 = arith.addf %116, %120 : vector<8x14xf32>
    %cst_21 = arith.constant dense<0.000000e+00> : vector<8xf32>
    %122 = vector.multi_reduction <add>, %121, %cst_21 [1] : vector<8x14xf32> to vector<8xf32>
    %123 = vector.shape_cast %122 : vector<8xf32> to vector<8x1xf32>
    %cst_22 = arith.constant dense<0.000000e+00> : vector<8x1xf32>
    %124 = tpu.matmul %66, %123, %cst_22 {dimension_numbers = #tpu.dot_dimension_numbers<[1], [0], [0], [1], [0, 0, 1, 1], [], []>} : vector<8x8xf32>, vector<8x1xf32>, vector<8x1xf32> -> vector<8x1xf32>
    %cst_23 = arith.constant 0.0714285746 : f32
    %125 = vector.broadcast %cst_23 : f32 to vector<8x1xf32>
    %126 = arith.mulf %124, %125 : vector<8x1xf32>
    %127 = vector.broadcast %126 : vector<8x1xf32> to vector<8x14xf32>
    %128 = arith.subf %121, %127 : vector<8x14xf32>
    %129 = arith.mulf %128, %128 : vector<8x14xf32>
    %cst_24 = arith.constant dense<0.000000e+00> : vector<8xf32>
    %130 = vector.multi_reduction <add>, %129, %cst_24 [1] : vector<8x14xf32> to vector<8xf32>
    %131 = vector.shape_cast %130 : vector<8xf32> to vector<8x1xf32>
    %cst_25 = arith.constant dense<0.000000e+00> : vector<8x1xf32>
    %132 = tpu.matmul %66, %131, %cst_25 {dimension_numbers = #tpu.dot_dimension_numbers<[1], [0], [0], [1], [0, 0, 1, 1], [], []>} : vector<8x8xf32>, vector<8x1xf32>, vector<8x1xf32> -> vector<8x1xf32>
    %cst_26 = arith.constant 0.0714285746 : f32
    %133 = vector.broadcast %cst_26 : f32 to vector<8x1xf32>
    %134 = arith.mulf %132, %133 : vector<8x1xf32>
    %cst_27 = arith.constant 9.99999974E-6 : f32
    %135 = vector.broadcast %cst_27 : f32 to vector<8x1xf32>
    %136 = arith.addf %134, %135 : vector<8x1xf32>
    %137 = math.rsqrt %136 : vector<8x1xf32>
    %138 = vector.broadcast %137 : vector<8x1xf32> to vector<8x14xf32>
    %139 = arith.mulf %128, %138 : vector<8x14xf32>
    %140 = vector.broadcast %56 : vector<8x1xf32> to vector<8x14xf32>
    %141 = arith.mulf %139, %140 : vector<8x14xf32>
    %142 = vector.broadcast %57 : vector<8x1xf32> to vector<8x14xf32>
    %143 = arith.addf %141, %142 : vector<8x14xf32>
    %144 = arith.negf %143 : vector<8x14xf32>
    %145 = math.exp %144 : vector<8x14xf32>
    %cst_28 = arith.constant 1.000000e+00 : f32
    %146 = vector.broadcast %cst_28 : f32 to vector<8x14xf32>
    %147 = arith.addf %146, %145 : vector<8x14xf32>
    %148 = arith.divf %146, %147 : vector<8x14xf32>
    %149 = vector.extract_strided_slice %68 {offsets = [0, 14], sizes = [8, 14], strides = [1, 1]} : vector<8x28xf32> to vector<8x14xf32>
    %cst_29 = arith.constant 0.0714285746 : f32
    %150 = vector.broadcast %cst_29 : f32 to vector<8x14xf32>
    %151 = arith.mulf %149, %150 : vector<8x14xf32>
    %cst_30 = arith.constant 0.000000e+00 : f32
    %152 = vector.broadcast %cst_30 : f32 to vector<8x4xf32>
    %153 = tpu.concatenate %152, %151, %152 in 1 : vector<8x4xf32>, vector<8x14xf32>, vector<8x4xf32> -> vector<8x22xf32>
    %cst_31 = arith.constant 0.000000e+00 : f32
    %154 = vector.broadcast %cst_31 : f32 to vector<8x14xf32>
    %155 = vector.broadcast %55 : vector<8x1xf32> to vector<8x14xf32>
    %156 = arith.addf %155, %154 : vector<8x14xf32>
    %157 = vector.extract_strided_slice %65 {offsets = [0, 0], sizes = [8, 1], strides = [1, 1]} : vector<8x9xf32> to vector<8x1xf32>
    %158 = vector.extract_strided_slice %153 {offsets = [0, 0], sizes = [8, 14], strides = [1, 1]} : vector<8x22xf32> to vector<8x14xf32>
    %159 = vector.broadcast %157 : vector<8x1xf32> to vector<8x14xf32>
    %160 = arith.mulf %159, %158 : vector<8x14xf32>
    %161 = arith.addf %156, %160 : vector<8x14xf32>
    %162 = vector.extract_strided_slice %65 {offsets = [0, 1], sizes = [8, 1], strides = [1, 1]} : vector<8x9xf32> to vector<8x1xf32>
    %163 = vector.extract_strided_slice %153 {offsets = [0, 1], sizes = [8, 14], strides = [1, 1]} : vector<8x22xf32> to vector<8x14xf32>
    %164 = vector.broadcast %162 : vector<8x1xf32> to vector<8x14xf32>
    %165 = arith.mulf %164, %163 : vector<8x14xf32>
    %166 = arith.addf %161, %165 : vector<8x14xf32>
    %167 = vector.extract_strided_slice %65 {offsets = [0, 2], sizes = [8, 1], strides = [1, 1]} : vector<8x9xf32> to vector<8x1xf32>
    %168 = vector.extract_strided_slice %153 {offsets = [0, 2], sizes = [8, 14], strides = [1, 1]} : vector<8x22xf32> to vector<8x14xf32>
    %169 = vector.broadcast %167 : vector<8x1xf32> to vector<8x14xf32>
    %170 = arith.mulf %169, %168 : vector<8x14xf32>
    %171 = arith.addf %166, %170 : vector<8x14xf32>
    %172 = vector.extract_strided_slice %65 {offsets = [0, 3], sizes = [8, 1], strides = [1, 1]} : vector<8x9xf32> to vector<8x1xf32>
    %173 = vector.extract_strided_slice %153 {offsets = [0, 3], sizes = [8, 14], strides = [1, 1]} : vector<8x22xf32> to vector<8x14xf32>
    %174 = vector.broadcast %172 : vector<8x1xf32> to vector<8x14xf32>
    %175 = arith.mulf %174, %173 : vector<8x14xf32>
    %176 = arith.addf %171, %175 : vector<8x14xf32>
    %177 = vector.extract_strided_slice %65 {offsets = [0, 4], sizes = [8, 1], strides = [1, 1]} : vector<8x9xf32> to vector<8x1xf32>
    %178 = vector.extract_strided_slice %153 {offsets = [0, 4], sizes = [8, 14], strides = [1, 1]} : vector<8x22xf32> to vector<8x14xf32>
    %179 = vector.broadcast %177 : vector<8x1xf32> to vector<8x14xf32>
    %180 = arith.mulf %179, %178 : vector<8x14xf32>
    %181 = arith.addf %176, %180 : vector<8x14xf32>
    %182 = vector.extract_strided_slice %65 {offsets = [0, 5], sizes = [8, 1], strides = [1, 1]} : vector<8x9xf32> to vector<8x1xf32>
    %183 = vector.extract_strided_slice %153 {offsets = [0, 5], sizes = [8, 14], strides = [1, 1]} : vector<8x22xf32> to vector<8x14xf32>
    %184 = vector.broadcast %182 : vector<8x1xf32> to vector<8x14xf32>
    %185 = arith.mulf %184, %183 : vector<8x14xf32>
    %186 = arith.addf %181, %185 : vector<8x14xf32>
    %187 = vector.extract_strided_slice %65 {offsets = [0, 6], sizes = [8, 1], strides = [1, 1]} : vector<8x9xf32> to vector<8x1xf32>
    %188 = vector.extract_strided_slice %153 {offsets = [0, 6], sizes = [8, 14], strides = [1, 1]} : vector<8x22xf32> to vector<8x14xf32>
    %189 = vector.broadcast %187 : vector<8x1xf32> to vector<8x14xf32>
    %190 = arith.mulf %189, %188 : vector<8x14xf32>
    %191 = arith.addf %186, %190 : vector<8x14xf32>
    %192 = vector.extract_strided_slice %65 {offsets = [0, 7], sizes = [8, 1], strides = [1, 1]} : vector<8x9xf32> to vector<8x1xf32>
    %193 = vector.extract_strided_slice %153 {offsets = [0, 7], sizes = [8, 14], strides = [1, 1]} : vector<8x22xf32> to vector<8x14xf32>
    %194 = vector.broadcast %192 : vector<8x1xf32> to vector<8x14xf32>
    %195 = arith.mulf %194, %193 : vector<8x14xf32>
    %196 = arith.addf %191, %195 : vector<8x14xf32>
    %197 = vector.extract_strided_slice %65 {offsets = [0, 8], sizes = [8, 1], strides = [1, 1]} : vector<8x9xf32> to vector<8x1xf32>
    %198 = vector.extract_strided_slice %153 {offsets = [0, 8], sizes = [8, 14], strides = [1, 1]} : vector<8x22xf32> to vector<8x14xf32>
    %199 = vector.broadcast %197 : vector<8x1xf32> to vector<8x14xf32>
    %200 = arith.mulf %199, %198 : vector<8x14xf32>
    %201 = arith.addf %196, %200 : vector<8x14xf32>
    %cst_32 = arith.constant dense<0.000000e+00> : vector<8xf32>
    %202 = vector.multi_reduction <add>, %201, %cst_32 [1] : vector<8x14xf32> to vector<8xf32>
    %203 = vector.shape_cast %202 : vector<8xf32> to vector<8x1xf32>
    %cst_33 = arith.constant dense<0.000000e+00> : vector<8x1xf32>
    %204 = tpu.matmul %66, %203, %cst_33 {dimension_numbers = #tpu.dot_dimension_numbers<[1], [0], [0], [1], [0, 0, 1, 1], [], []>} : vector<8x8xf32>, vector<8x1xf32>, vector<8x1xf32> -> vector<8x1xf32>
    %cst_34 = arith.constant 0.0714285746 : f32
    %205 = vector.broadcast %cst_34 : f32 to vector<8x1xf32>
    %206 = arith.mulf %204, %205 : vector<8x1xf32>
    %207 = vector.broadcast %206 : vector<8x1xf32> to vector<8x14xf32>
    %208 = arith.subf %201, %207 : vector<8x14xf32>
    %209 = arith.mulf %208, %208 : vector<8x14xf32>
    %cst_35 = arith.constant dense<0.000000e+00> : vector<8xf32>
    %210 = vector.multi_reduction <add>, %209, %cst_35 [1] : vector<8x14xf32> to vector<8xf32>
    %211 = vector.shape_cast %210 : vector<8xf32> to vector<8x1xf32>
    %cst_36 = arith.constant dense<0.000000e+00> : vector<8x1xf32>
    %212 = tpu.matmul %66, %211, %cst_36 {dimension_numbers = #tpu.dot_dimension_numbers<[1], [0], [0], [1], [0, 0, 1, 1], [], []>} : vector<8x8xf32>, vector<8x1xf32>, vector<8x1xf32> -> vector<8x1xf32>
    %cst_37 = arith.constant 0.0714285746 : f32
    %213 = vector.broadcast %cst_37 : f32 to vector<8x1xf32>
    %214 = arith.mulf %212, %213 : vector<8x1xf32>
    %cst_38 = arith.constant 9.99999974E-6 : f32
    %215 = vector.broadcast %cst_38 : f32 to vector<8x1xf32>
    %216 = arith.addf %214, %215 : vector<8x1xf32>
    %217 = math.rsqrt %216 : vector<8x1xf32>
    %218 = vector.broadcast %217 : vector<8x1xf32> to vector<8x14xf32>
    %219 = arith.mulf %208, %218 : vector<8x14xf32>
    %220 = vector.broadcast %58 : vector<8x1xf32> to vector<8x14xf32>
    %221 = arith.mulf %219, %220 : vector<8x14xf32>
    %222 = vector.broadcast %59 : vector<8x1xf32> to vector<8x14xf32>
    %223 = arith.addf %221, %222 : vector<8x14xf32>
    %224 = arith.negf %223 : vector<8x14xf32>
    %225 = math.exp %224 : vector<8x14xf32>
    %cst_39 = arith.constant 1.000000e+00 : f32
    %226 = vector.broadcast %cst_39 : f32 to vector<8x14xf32>
    %227 = arith.addf %226, %225 : vector<8x14xf32>
    %228 = arith.divf %226, %227 : vector<8x14xf32>
    %c0_40 = arith.constant 0 : index
    %c0_41 = arith.constant 0 : index
    %229 = vector.load %arg6[%c0_40, %c0_41] : memref<14x256xf32, #tpu.memory_space<vmem>>, vector<14x256xf32>
    %cst_42 = arith.constant dense<0.000000e+00> : vector<8x256xf32>
    %230 = tpu.matmul %148, %229, %cst_42 {dimension_numbers = #tpu.dot_dimension_numbers<[1], [0], [0], [1], [0, 0, 1, 1], [], []>} : vector<8x14xf32>, vector<14x256xf32>, vector<8x256xf32> -> vector<8x256xf32>
    %c0_43 = arith.constant 0 : index
    %c0_44 = arith.constant 0 : index
    %231 = vector.load %arg7[%c0_43, %c0_44] : memref<14x256xf32, #tpu.memory_space<vmem>>, vector<14x256xf32>
    %cst_45 = arith.constant dense<0.000000e+00> : vector<8x256xf32>
    %232 = tpu.matmul %228, %231, %cst_45 {dimension_numbers = #tpu.dot_dimension_numbers<[1], [0], [0], [1], [0, 0, 1, 1], [], []>} : vector<8x14xf32>, vector<14x256xf32>, vector<8x256xf32> -> vector<8x256xf32>
    %233 = arith.mulf %53, %230 : vector<8x256xf32>
    %234 = arith.mulf %233, %232 : vector<8x256xf32>
    %c0_46 = arith.constant 0 : index
    %c0_47 = arith.constant 0 : index
    %235 = vector.load %arg11[%c0_46, %c0_47] : memref<256x4xf32, #tpu.memory_space<vmem>>, vector<256x4xf32>
    %cst_48 = arith.constant dense<0.000000e+00> : vector<8x4xf32>
    %236 = tpu.matmul %234, %235, %cst_48 {dimension_numbers = #tpu.dot_dimension_numbers<[1], [0], [0], [1], [0, 0, 1, 1], [], []>} : vector<8x256xf32>, vector<256x4xf32>, vector<8x4xf32> -> vector<8x4xf32>
    %cst_49 = arith.constant 0.0204081628 : f32
    %237 = vector.broadcast %cst_49 : f32 to vector<8x4xf32>
    %238 = arith.mulf %236, %237 : vector<8x4xf32>
    %239 = vector.shape_cast %238 : vector<8x4xf32> to vector<1x8x4xf32>
    %cst_50 = arith.constant dense<0.000000e+00> : vector<1xf32>
    %240 = vector.multi_reduction <add>, %239, %cst_50 [1, 2] : vector<1x8x4xf32> to vector<1xf32>
    %241 = vector.shape_cast %240 : vector<1xf32> to vector<1x1x1xf32>
    %242 = vector.extract %241[0, 0, 0] : f32 from vector<1x1x1xf32>
    %243 = vector.broadcast %242 : f32 to vector<1x1xf32>
    %cst_51 = arith.constant 3.200000e+01 : f32
    %244 = vector.broadcast %cst_51 : f32 to vector<1x1xf32>
    %245 = arith.divf %243, %244 : vector<1x1xf32>
    %246 = vector.broadcast %245 : vector<1x1xf32> to vector<8x4xf32>
    %247 = arith.subf %238, %246 : vector<8x4xf32>
    %248 = arith.mulf %247, %247 : vector<8x4xf32>
    %249 = vector.shape_cast %248 : vector<8x4xf32> to vector<1x8x4xf32>
    %cst_52 = arith.constant dense<0.000000e+00> : vector<1xf32>
    %250 = vector.multi_reduction <add>, %249, %cst_52 [1, 2] : vector<1x8x4xf32> to vector<1xf32>
    %251 = vector.shape_cast %250 : vector<1xf32> to vector<1x1x1xf32>
    %252 = vector.extract %251[0, 0, 0] : f32 from vector<1x1x1xf32>
    %253 = vector.broadcast %252 : f32 to vector<1x1xf32>
    %cst_53 = arith.constant 3.200000e+01 : f32
    %254 = vector.broadcast %cst_53 : f32 to vector<1x1xf32>
    %255 = arith.divf %253, %254 : vector<1x1xf32>
    %cst_54 = arith.constant 9.99999974E-6 : f32
    %256 = vector.broadcast %cst_54 : f32 to vector<1x1xf32>
    %257 = arith.addf %255, %256 : vector<1x1xf32>
    %258 = math.rsqrt %257 : vector<1x1xf32>
    %259 = vector.broadcast %258 : vector<1x1xf32> to vector<8x4xf32>
    %260 = arith.mulf %247, %259 : vector<8x4xf32>
    %261 = vector.broadcast %60 : vector<8x1xf32> to vector<8x4xf32>
    %262 = arith.mulf %260, %261 : vector<8x4xf32>
    %263 = vector.broadcast %61 : vector<8x1xf32> to vector<8x4xf32>
    %264 = arith.addf %262, %263 : vector<8x4xf32>
    %265 = vector.broadcast %62 : vector<8x1xf32> to vector<8x4xf32>
    %266 = arith.mulf %264, %265 : vector<8x4xf32>
    %267 = vector.broadcast %63 : vector<8x1xf32> to vector<8x4xf32>
    %268 = arith.mulf %264, %267 : vector<8x4xf32>
    %269 = vector.broadcast %64 : vector<8x1xf32> to vector<8x4xf32>
    %270 = arith.mulf %264, %269 : vector<8x4xf32>
    %271 = tpu.transpose %268, [1, 0] : vector<8x4xf32> -> vector<4x8xf32>
    %cst_55 = arith.constant dense<0.000000e+00> : vector<8x8xf32>
    %272 = tpu.matmul %266, %271, %cst_55 {dimension_numbers = #tpu.dot_dimension_numbers<[1], [0], [0], [1], [0, 0, 1, 1], [], []>} : vector<8x4xf32>, vector<4x8xf32>, vector<8x8xf32> -> vector<8x8xf32>
    %cst_56 = arith.constant 0.353553385 : f32
    %273 = vector.broadcast %cst_56 : f32 to vector<8x8xf32>
    %274 = arith.mulf %272, %273 : vector<8x8xf32>
    %cst_57 = arith.constant dense<0xFF800000> : vector<8xf32>
    %275 = vector.multi_reduction <maximumf>, %274, %cst_57 [1] : vector<8x8xf32> to vector<8xf32>
    %cst_58 = arith.constant 0xFF800000 : f32
    %276 = vector.broadcast %cst_58 : f32 to vector<8xf32>
    %277 = arith.maximumf %276, %275 : vector<8xf32>
    %278 = vector.shape_cast %277 : vector<8xf32> to vector<8x1xf32>
    %279 = vector.broadcast %278 : vector<8x1xf32> to vector<8x8xf32>
    %280 = arith.subf %274, %279 : vector<8x8xf32>
    %281 = math.exp %280 : vector<8x8xf32>
    %cst_59 = arith.constant dense<0.000000e+00> : vector<8xf32>
    %282 = vector.multi_reduction <add>, %281, %cst_59 [1] : vector<8x8xf32> to vector<8xf32>
    %283 = vector.shape_cast %282 : vector<8xf32> to vector<8x1xf32>
    %284 = vector.broadcast %283 : vector<8x1xf32> to vector<8x8xf32>
    %285 = arith.divf %281, %284 : vector<8x8xf32>
    %cst_60 = arith.constant dense<0.000000e+00> : vector<8x4xf32>
    %286 = tpu.matmul %285, %270, %cst_60 {dimension_numbers = #tpu.dot_dimension_numbers<[1], [0], [0], [1], [0, 0, 1, 1], [], []>} : vector<8x8xf32>, vector<8x4xf32>, vector<8x4xf32> -> vector<8x4xf32>
    %cst_61 = arith.constant dense<0.000000e+00> : vector<8xf32>
    %287 = vector.multi_reduction <add>, %286, %cst_61 [1] : vector<8x4xf32> to vector<8xf32>
    %288 = vector.shape_cast %287 : vector<8xf32> to vector<8x1xf32>
    %cst_62 = arith.constant 4.000000e+00 : f32
    %289 = vector.broadcast %cst_62 : f32 to vector<8x1xf32>
    %290 = arith.divf %288, %289 : vector<8x1xf32>
    %291 = arith.negf %290 : vector<8x1xf32>
    %292 = math.exp %291 : vector<8x1xf32>
    %cst_63 = arith.constant 1.000000e+00 : f32
    %293 = vector.broadcast %cst_63 : f32 to vector<8x1xf32>
    %294 = arith.addf %293, %292 : vector<8x1xf32>
    %295 = arith.divf %293, %294 : vector<8x1xf32>
    %296 = vector.broadcast %295 : vector<8x1xf32> to vector<8x256xf32>
    %297 = arith.mulf %234, %296 : vector<8x256xf32>
    %c15_i32_64 = arith.constant 15 : i32
    %298 = tpu.dynamic_rotate %297 by %c15_i32_64 dim 1 : vector<8x256xf32>, i32 -> vector<8x256xf32>
    %299 = vector.extract_strided_slice %2 {offsets = [0, 0], sizes = [1, 256], strides = [1, 1]} : vector<9x256xf32> to vector<1x256xf32>
    %300 = vector.broadcast %299 : vector<1x256xf32> to vector<8x256xf32>
    %301 = arith.mulf %298, %300 : vector<8x256xf32>
    %c14_i32_65 = arith.constant 14 : i32
    %302 = tpu.dynamic_rotate %297 by %c14_i32_65 dim 1 : vector<8x256xf32>, i32 -> vector<8x256xf32>
    %303 = vector.extract_strided_slice %2 {offsets = [1, 0], sizes = [1, 256], strides = [1, 1]} : vector<9x256xf32> to vector<1x256xf32>
    %304 = vector.broadcast %303 : vector<1x256xf32> to vector<8x256xf32>
    %305 = arith.mulf %302, %304 : vector<8x256xf32>
    %c13_i32_66 = arith.constant 13 : i32
    %306 = tpu.dynamic_rotate %297 by %c13_i32_66 dim 1 : vector<8x256xf32>, i32 -> vector<8x256xf32>
    %307 = vector.extract_strided_slice %2 {offsets = [2, 0], sizes = [1, 256], strides = [1, 1]} : vector<9x256xf32> to vector<1x256xf32>
    %308 = vector.broadcast %307 : vector<1x256xf32> to vector<8x256xf32>
    %309 = arith.mulf %306, %308 : vector<8x256xf32>
    %c1_i32_67 = arith.constant 1 : i32
    %310 = tpu.dynamic_rotate %297 by %c1_i32_67 dim 1 : vector<8x256xf32>, i32 -> vector<8x256xf32>
    %311 = vector.extract_strided_slice %2 {offsets = [3, 0], sizes = [1, 256], strides = [1, 1]} : vector<9x256xf32> to vector<1x256xf32>
    %312 = vector.broadcast %311 : vector<1x256xf32> to vector<8x256xf32>
    %313 = arith.mulf %310, %312 : vector<8x256xf32>
    %314 = vector.extract_strided_slice %2 {offsets = [4, 0], sizes = [1, 256], strides = [1, 1]} : vector<9x256xf32> to vector<1x256xf32>
    %315 = vector.broadcast %314 : vector<1x256xf32> to vector<8x256xf32>
    %316 = arith.mulf %297, %315 : vector<8x256xf32>
    %c255_i32_68 = arith.constant 255 : i32
    %317 = tpu.dynamic_rotate %297 by %c255_i32_68 dim 1 : vector<8x256xf32>, i32 -> vector<8x256xf32>
    %318 = vector.extract_strided_slice %2 {offsets = [5, 0], sizes = [1, 256], strides = [1, 1]} : vector<9x256xf32> to vector<1x256xf32>
    %319 = vector.broadcast %318 : vector<1x256xf32> to vector<8x256xf32>
    %320 = arith.mulf %317, %319 : vector<8x256xf32>
    %c243_i32_69 = arith.constant 243 : i32
    %321 = tpu.dynamic_rotate %297 by %c243_i32_69 dim 1 : vector<8x256xf32>, i32 -> vector<8x256xf32>
    %322 = vector.extract_strided_slice %2 {offsets = [6, 0], sizes = [1, 256], strides = [1, 1]} : vector<9x256xf32> to vector<1x256xf32>
    %323 = vector.broadcast %322 : vector<1x256xf32> to vector<8x256xf32>
    %324 = arith.mulf %321, %323 : vector<8x256xf32>
    %c242_i32_70 = arith.constant 242 : i32
    %325 = tpu.dynamic_rotate %297 by %c242_i32_70 dim 1 : vector<8x256xf32>, i32 -> vector<8x256xf32>
    %326 = vector.extract_strided_slice %2 {offsets = [7, 0], sizes = [1, 256], strides = [1, 1]} : vector<9x256xf32> to vector<1x256xf32>
    %327 = vector.broadcast %326 : vector<1x256xf32> to vector<8x256xf32>
    %328 = arith.mulf %325, %327 : vector<8x256xf32>
    %c241_i32_71 = arith.constant 241 : i32
    %329 = tpu.dynamic_rotate %297 by %c241_i32_71 dim 1 : vector<8x256xf32>, i32 -> vector<8x256xf32>
    %330 = vector.extract_strided_slice %2 {offsets = [8, 0], sizes = [1, 256], strides = [1, 1]} : vector<9x256xf32> to vector<1x256xf32>
    %331 = vector.broadcast %330 : vector<1x256xf32> to vector<8x256xf32>
    %332 = arith.mulf %329, %331 : vector<8x256xf32>
    %333 = tpu.concatenate %301, %305, %309, %313, %316, %320, %324, %328, %332 in 0 : vector<8x256xf32>, vector<8x256xf32>, vector<8x256xf32>, vector<8x256xf32>, vector<8x256xf32>, vector<8x256xf32>, vector<8x256xf32>, vector<8x256xf32>, vector<8x256xf32> -> vector<72x256xf32>
    %c0_72 = arith.constant 0 : index
    %c0_73 = arith.constant 0 : index
    %334 = vector.load %arg12[%c0_72, %c0_73] : memref<16x72xf32, #tpu.memory_space<vmem>>, vector<16x72xf32>
    %cst_74 = arith.constant dense<0.000000e+00> : vector<16x256xf32>
    %335 = tpu.matmul %334, %333, %cst_74 {dimension_numbers = #tpu.dot_dimension_numbers<[1], [0], [0], [1], [0, 0, 1, 1], [], []>} : vector<16x72xf32>, vector<72x256xf32>, vector<16x256xf32> -> vector<16x256xf32>
    %c0_75 = arith.constant 0 : index
    %c0_76 = arith.constant 0 : index
    %336 = vector.load %arg13[%c0_75, %c0_76] : memref<16x2xf32, #tpu.memory_space<vmem>>, vector<16x2xf32>
    %337 = vector.extract_strided_slice %336 {offsets = [0, 0], sizes = [16, 1], strides = [1, 1]} : vector<16x2xf32> to vector<16x1xf32>
    %338 = vector.broadcast %337 : vector<16x1xf32> to vector<16x256xf32>
    %339 = arith.mulf %335, %338 : vector<16x256xf32>
    %340 = vector.extract_strided_slice %336 {offsets = [0, 1], sizes = [16, 1], strides = [1, 1]} : vector<16x2xf32> to vector<16x1xf32>
    %341 = vector.broadcast %340 : vector<16x1xf32> to vector<16x256xf32>
    %342 = arith.addf %339, %341 : vector<16x256xf32>
    %343 = arith.negf %342 : vector<16x256xf32>
    %344 = math.exp %343 : vector<16x256xf32>
    %cst_77 = arith.constant 1.000000e+00 : f32
    %345 = vector.broadcast %cst_77 : f32 to vector<16x256xf32>
    %346 = arith.addf %345, %344 : vector<16x256xf32>
    %347 = arith.divf %345, %346 : vector<16x256xf32>
    %348 = arith.mulf %342, %347 : vector<16x256xf32>
    %c0_78 = arith.constant 0 : index
    %c0_79 = arith.constant 0 : index
    %c0_80 = arith.constant 0 : index
    %349 = vector.load %arg14[%c0_78, %c0_79, %c0_80] : memref<1x16x256xf32, #tpu.memory_space<vmem>>, vector<1x16x256xf32>
    %350 = vector.shape_cast %349 : vector<1x16x256xf32> to vector<16x256xf32>
    %351 = vector.shape_cast %348 : vector<16x256xf32> to vector<1x16x256xf32>
    tpu.vector_store %arg14[%c0_78, %c0_79, %c0_80], %351 {strides = array<i32>} : memref<1x16x256xf32, #tpu.memory_space<vmem>>, vector<1x16x256xf32>,
    return
  }
  func.func @transform_0(%arg0: i32) -> (i32, i32, i32) {
    %c0_i32 = arith.constant 0 : i32
    %c0_i32_0 = arith.constant 0 : i32
    %c0_i32_1 = arith.constant 0 : i32
    return %arg0, %c0_i32, %c0_i32_0 : i32, i32, i32
  }
  func.func @transform_1(%arg0: i32) -> (i32, i32) {
    %c0_i32 = arith.constant 0 : i32
    %c0_i32_0 = arith.constant 0 : i32
    %c0_i32_1 = arith.constant 0 : i32
    return %c0_i32, %c0_i32_0 : i32, i32
  }
  func.func @transform_2(%arg0: i32) -> (i32, i32) {
    %c0_i32 = arith.constant 0 : i32
    %c0_i32_0 = arith.constant 0 : i32
    %c0_i32_1 = arith.constant 0 : i32
    return %c0_i32, %c0_i32_0 : i32, i32
  }
  func.func @transform_3(%arg0: i32) -> (i32, i32) {
    %c0_i32 = arith.constant 0 : i32
    %c0_i32_0 = arith.constant 0 : i32
    %c0_i32_1 = arith.constant 0 : i32
    return %c0_i32, %c0_i32_0 : i32, i32
  }
  func.func @transform_4(%arg0: i32) -> (i32, i32) {
    %c0_i32 = arith.constant 0 : i32
    %c0_i32_0 = arith.constant 0 : i32
    %c0_i32_1 = arith.constant 0 : i32
    return %c0_i32, %c0_i32_0 : i32, i32
  }
  func.func @transform_5(%arg0: i32) -> (i32, i32) {
    %c0_i32 = arith.constant 0 : i32
    %c0_i32_0 = arith.constant 0 : i32
    %c0_i32_1 = arith.constant 0 : i32
    return %c0_i32, %c0_i32_0 : i32, i32
  }
  func.func @transform_6(%arg0: i32) -> (i32, i32) {
    %c0_i32 = arith.constant 0 : i32
    %c0_i32_0 = arith.constant 0 : i32
    %c0_i32_1 = arith.constant 0 : i32
    return %c0_i32, %c0_i32_0 : i32, i32
  }
  func.func @transform_7(%arg0: i32) -> (i32, i32) {
    %c0_i32 = arith.constant 0 : i32
    %c0_i32_0 = arith.constant 0 : i32
    %c0_i32_1 = arith.constant 0 : i32
    return %c0_i32, %c0_i32_0 : i32, i32
  }
  func.func @transform_8(%arg0: i32) -> (i32, i32) {
    %c0_i32 = arith.constant 0 : i32
    %c0_i32_0 = arith.constant 0 : i32
    %c0_i32_1 = arith.constant 0 : i32
    return %c0_i32, %c0_i32_0 : i32, i32
  }
  func.func @transform_9(%arg0: i32) -> (i32, i32) {
    %c0_i32 = arith.constant 0 : i32
    %c0_i32_0 = arith.constant 0 : i32
    %c0_i32_1 = arith.constant 0 : i32
    return %c0_i32, %c0_i32_0 : i32, i32
  }
  func.func @transform_10(%arg0: i32) -> (i32, i32) {
    %c0_i32 = arith.constant 0 : i32
    %c0_i32_0 = arith.constant 0 : i32
    %c0_i32_1 = arith.constant 0 : i32
    return %c0_i32, %c0_i32_0 : i32, i32
  }
  func.func @transform_11(%arg0: i32) -> (i32, i32) {
    %c0_i32 = arith.constant 0 : i32
    %c0_i32_0 = arith.constant 0 : i32
    %c0_i32_1 = arith.constant 0 : i32
    return %c0_i32, %c0_i32_0 : i32, i32
  }
  func.func @transform_12(%arg0: i32) -> (i32, i32) {
    %c0_i32 = arith.constant 0 : i32
    %c0_i32_0 = arith.constant 0 : i32
    %c0_i32_1 = arith.constant 0 : i32
    return %c0_i32, %c0_i32_0 : i32, i32
  }
  func.func @transform_13(%arg0: i32) -> (i32, i32, i32) {
    %c0_i32 = arith.constant 0 : i32
    %c0_i32_0 = arith.constant 0 : i32
    %c0_i32_1 = arith.constant 0 : i32
    return %arg0, %c0_i32, %c0_i32_0 : i32, i32, i32
  }
}

</mosaic_0001>

<bundles_post_ra>
// kernel: bottleneck_forward.1
= control target key start
LH: loop header
LB: loop body
LE: loop exit
PB: predicated region body
PF: predicated region fallthrough
CT: control target
= control target key end

     0   :  { %s2468_s25 = smov 0   ;;  %s3146_s0 = inlined_call_operand.vmem [shape: f32[2,8,256], index: 0, kind: input, shape index: {}]   ;;  %s3147_s1 = inlined_call_operand.vmem [shape: f32[9,256], index: 1, kind: input, shape index: {}]   ;;  %s3148_s2 = inlined_call_operand.vmem [shape: f32[8,72], index: 2, kind: input, shape index: {}]   ;;  %s3149_s3 = inlined_call_operand.vmem [shape: f32[8,2], index: 3, kind: input, shape index: {}]   ;;  %s3150_s4 = inlined_call_operand.vmem [shape: f32[256,28], index: 4, kind: input, shape index: {}]   ;;  %s3151_s5 = inlined_call_operand.vmem [shape: f32[14,256], index: 5, kind: input, shape index: {}]   ;;  %s3152_s6 = inlined_call_operand.vmem [shape: f32[14,256], index: 6, kind: input, shape index: {}]   ;;  %s3153_s7 = inlined_call_operand.vmem [shape: f32[8,9], index: 7, kind: input, shape index: {}]   ;;  %s3154_s8 = inlined_call_operand.vmem [shape: f32[8,10], index: 8, kind: input, shape index: {}]   ;;  %s3155_s9 = inlined_call_operand.vmem [shape: f32[8,8], index: 9, kind: input, shape index: {}]   ;;  %s3156_s10 = inlined_call_operand.vmem [shape: f32[256,4], index: 10, kind: input, shape index: {}]   ;;  %s3157_s11 = inlined_call_operand.vmem [shape: f32[16,72], index: 11, kind: input, shape index: {}]   ;;  %s3158_s12 = inlined_call_operand.vmem [shape: f32[16,2], index: 12, kind: input, shape index: {}]   ;;  %s3159_s13 = inlined_call_operand.vmem [shape: f32[2,16,256], index: 13, kind: output, shape index: {}]  }
   0x1 LB: > { %s2095_s26 = sadd.s32 4294967295, %s2367_s25   ;;  %p2099_p0 = scmp.ge.s32.totalorder %s2367_s25, 1  ;;  %s2367_s25 = sphi %s2468_s25, %s23_s25  }
   0x2   : > { %p387_p1 = scmp.lt.s32.totalorder %s2367_s25, 3 }
   0x4   : > { %p388_p2 = pnand %p2099_p0, %p387_p1 }
   0x5   : > { %p431_p3 = scmp.lt.s32.totalorder (!%p388_p2), %s2095_s26, 1  ;;  %s2369_s14 = smov (!%p388_p2), 114  }
   0x6   : > { %391 = sbr.rel (%p388_p2) target bundleno = 4408 (0x1138), region = 72  ;;  %s2370_s15 = smov (!%p388_p2), 113  }
   0x7   : > { %s2371_s16 = smov (!%p388_p2), 115   ;;  %s2372_s17 = smov (!%p388_p2), 127  }
   0x8   : > { %s2373_s18 = smov (!%p388_p2), 1   ;;  %s3164_s19 = smov (!%p388_p2), 13  }
   0x9   : > { %s3162_s20 = smov (!%p388_p2), 14   ;;  %s3160_s21 = smov (!%p388_p2), 15  }
   0xa   : > { %s2388_s28 = smov (!%p388_p2), 125   ;;  %s2391_s29 = smov (!%p388_p2), 123  }
   0xb   : > { %s3170_s26 = smov (!%p431_p3, %s2095_s26), 1  ;;  %v2374_v2 = vmov 0.0   ;;  %v2376_v3 = vmov 1   ;;  %v2377_v4 = vmov 0   ;;  %v671_v5 = vld [vmem:[%s3149_s3] sm:$0xff]  ;;  %v451_v7 = vlaneseq  ;;  %v2539_v14 = vld [vmem:[%s3147_s1 + $0x8] sm:$0xff] }
   0xc   : > { %s2133_s27 = sshll.u32 %s3170_s26, 4  ;;  %664 = vmatprep.mubr.f32.mxu0 %v2374_v2  ;;  %2289 = vset.pattern.permute.xlu1 %v2376_v3  ;;  %v2527_v6 = vld [vmem:[%s3153_s7] sm:$0xff]  ;;  %v2105_v16 = vld [vmem:[%s3147_s1 + $0x18] ss:$0 sm:$0xff]  ;;  %v2104_v17 = vld [vmem:[%s3147_s1 + $0x10] ss:$0 sm:$0xff] }
   0xd   : > { %s435_s30 = scalar_lea.vmem %s3146_s0, %s2133_s27  ;;  %2288 = vset.pattern.permute.xlu0 %v2377_v4  ;;  %v2530_v8 = vshrl.u32 %v451_v7, 7  ;;  %v2532_v9 = vand.u32 127, %v451_v7  ;;  %v2546_v15 = vld [vmem:[%s3147_s1] sm:$0xff]  ;;  %vm596_vm8 = vcmask 588800   ;;  %vm809_vm9 = vcmask 31744   ;;  %s2393_s22 = smov 122  }
   0xe   : > { %v2482_v0 = vld [vmem:[%s435_s30] sm:$0xff]  ;;  %v2488_v1 = vld [vmem:[%s435_s30 + $0x8] sm:$0xff]  ;;  %vm811_vm10 = vcmask 146432   ;;  %s2392_s30 = smov 121   ;;  %s2394_s23 = smov 120   ;;  %vm906_vm11 = vcmask 113664  }
   0xf   : > { %561 = vrot.lane.b32.xlu1 %v2482_v0, %s2369_s14  ;;  %578 = vrot.lane.b32.xlu0 %v2482_v0, %s2370_s15  ;;  %v553_v12 = vsub.s32 6, %v2530_v8  ;;  %v570_v13 = vsub.s32 7, %v2530_v8  ;;  %vm565_vm0 = vcmp.lt.s32.totalorder %v2532_v9, 114  ;;  %vm582_vm1 = vcmp.lt.s32.totalorder %v2532_v9, 113  ;;  %s2395_s24 = smov 118  }
  0x10   : > { %vm548_vm2 = vcmp.lt.s32.totalorder %v2532_v9, 115  ;;  %v536_v22 = vsub.s32 5, %v2530_v8  ;;  %v519_v23 = vsub.s32 4, %v2530_v8  ;;  %vm531_vm3 = vcmp.lt.s32.totalorder %v2532_v9, 127 }
  0x11   : > { %v2556_v20 = vrot.slane %v2546_v15, %v553_v12  ;;  %v2559_v21 = vrot.slane %v2539_v14, %v570_v13  ;;  %v2570_v27 = vrot.slane %v2546_v15, %v570_v13  ;;  %v2575_v30 = vrot.slane %v2539_v14, %v553_v12 }
  0x12   : > { %v2580_v35 = vrot.slane %v2546_v15, %v536_v22  ;;  %v509_v39 = vsub.s32 3, %v2530_v8  ;;  %v2591_v42 = vrot.slane %v2539_v14, %v536_v22  ;;  %v2594_v43 = vrot.slane %v2539_v14, %v519_v23 }
  0x13   : > { %563 = vrot.lane.b32.xlu1 %v2488_v1, %s2369_s14  ;;  %580 = vrot.lane.b32.xlu0 %v2488_v1, %s2370_s15  ;;  %v2597_v44 = vrot.slane %v2546_v15, %v519_v23  ;;  %vm504_vm4 = vcmp.lt.s32.totalorder %v2532_v9, 1  ;;  %v492_v54 = vsub.s32 2, %v2530_v8  ;;  %vm487_vm5 = vcmp.lt.s32.totalorder %v2532_v9, 13 }
  0x14   : > { %v2605_v49 = vrot.slane %v2546_v15, %v509_v39  ;;  %v2608_v50 = vrot.slane %v2539_v14, %v509_v39  ;;  %v526_v53 = vmul.f32 %v2594_v43, %v2488_v1  ;;  %v475_v60 = vsub.s32 1, %v2530_v8  ;;  %v731_v39 = vld [vmem:[%s3150_s4 + $0xe8] sm:$0xff] }
  0x15   : > { %v525_v55 = vmul.f32 %v2597_v44, %v2482_v0  ;;  %v2626_v63 = vrot.slane %v2546_v15, %v492_v54  ;;  %vm470_vm6 = vcmp.lt.s32.totalorder %v2532_v9, 14  ;;  %vm453_vm7 = vcmp.lt.s32.totalorder %v2532_v9, 15  ;;  %v1896_v9 = vld [vmem:[%s3157_s11 + $0x8] sm:$0xff] }
  0x16   : > { %vm2396_vm12 = vmmov 0   ;;  %vm910_vm13 = vcmask 64512   ;;  %vm1331_vm14 = vcmask 1045504  }
  0x17   : > { %546 = vrot.lane.b32.xlu1 %v2488_v1, %s2371_s16  ;;  %544 = vrot.lane.b32.xlu0 %v2482_v0, %s2371_s16 }
  0x1b   : > { %529 = vrot.lane.b32.xlu1 %v2488_v1, %s2372_s17  ;;  %527 = vrot.lane.b32.xlu0 %v2482_v0, %s2372_s17 }
  0x1f   : > { %502 = vrot.lane.b32.xlu1 %v2488_v1, %s2373_s18  ;;  %500 = vrot.lane.b32.xlu0 %v2482_v0, %s2373_s18 }
  0x23   : > { %485 = vrot.lane.b32.xlu1 %v2488_v1, %s3164_s19  ;;  %483 = vrot.lane.b32.xlu0 %v2482_v0, %s3164_s19  ;;  %s2389_s19 = smov 126  }
  0x27   : > { %468 = vrot.lane.b32.xlu1 %v2488_v1, %s3162_s20  ;;  %466 = vrot.lane.b32.xlu0 %v2482_v0, %s3162_s20  ;;  %s2390_s20 = smov 124  }
  0x2b   : > { %449 = vrot.lane.b32.xlu1 %v2488_v1, %s3160_s21  ;;  %447 = vrot.lane.b32.xlu0 %v2482_v0, %s3160_s21  ;;  %v2629_v0 = vrot.slane %v2539_v14, %v492_v54  ;;  %v726_v54 = vld [vmem:[%s3150_s4 + $0xc0] sm:$0xff]  ;;  %s2385_s21 = smov 4  }
  0x2f   : > { %680 = vperm.xlu1 %2289, %v671_v5   ;;  %674 = vperm.xlu0 %2288, %v671_v5  }
  0x33   : > { %827 = vperm.xlu1 %2289, %v2527_v6  }
  0x81   : > { %v562_v10 = vpop.permute.xlu1 %561  ;;  %v579_v11 = vpop.permute.xlu0 %578 }
  0x85   : > { %v564_v18 = vpop.permute.xlu1 %563  ;;  %v581_v19 = vpop.permute.xlu0 %580 }
  0x86   : > { %v567_v24 = vsel %vm565_vm0, %v564_v18, %v562_v10  ;;  %v583_v25 = vsel %vm582_vm1, %v579_v11, %v581_v19  ;;  %v584_v26 = vsel %vm582_vm1, %v581_v19, %v579_v11  ;;  %v566_v28 = vsel %vm565_vm0, %v562_v10, %v564_v18 }
  0x87   : > { %v594_v29 = vmul.f32 %v2105_v16, %v584_v26  ;;  %v593_v31 = vmul.f32 %v2104_v17, %v583_v25  ;;  %v577_v34 = vmul.f32 %v2559_v21, %v567_v24  ;;  %v576_v38 = vmul.f32 %v2570_v27, %v566_v28 }
  0x88   : > { %v2637_v11 = vrot.slane %v2546_v15, %v475_v60  ;;  %v2642_v16 = vrot.slane %v2539_v14, %v475_v60  ;;  %v458_v17 = vsub.s32 0, %v2530_v8  ;;  %v723_v60 = vld [vmem:[%s3150_s4 + $0xa8] sm:$0xff] }
  0x89   : > { %v547_v32 = vpop.permute.xlu1 %546  ;;  %614 = vmatprep.subr.mxu0 %v594_v29  ;;  %v545_v33 = vpop.permute.xlu0 %544 }
  0x8a   : > { %v549_v36 = vsel %vm548_vm2, %v545_v33, %v547_v32  ;;  %v550_v37 = vsel %vm548_vm2, %v547_v32, %v545_v33  ;;  %615 = vmatpush1.msra.mxu0 %v593_v31  ;;  %v2653_v26 = vrot.slane %v2546_v15, %v458_v17  ;;  %v2656_v8 = vrot.slane %v2539_v14, %v458_v17  ;;  %v595_v15 = vld [vmem:[%s3148_s2] sm:$0xff]  ;;  %v733_v14 = vld [vmem:[%s3150_s4 + $0xf8] sm:$0xff]  ;;  %v703_v17 = vld [vmem:[%s3150_s4 + $0x8] sm:$0xff] }
  0x8b   : > { %v559_v40 = vmul.f32 %v2556_v20, %v549_v36  ;;  %v560_v41 = vmul.f32 %v2575_v30, %v550_v37  ;;  %616 = vmatprep.subr.mxu0 %v577_v34  ;;  %2135 = vmatprep.subr.mxu1 %v733_v14  ;;  %v717_v36 = vld [vmem:[%s3150_s4 + $0x78] sm:$0xff]  ;;  %v732_v37 = vld [vmem:[%s3150_s4 + $0xf0] sm:$0xff] }
  0x8c   : > { %617 = vmatpush1.msra.mxu0 %v576_v38  ;;  %2136 = vmatpush3.msra.mxu1 %v717_v36  ;;  %v716_v38 = vld [vmem:[%s3150_s4 + $0x70] sm:$0xff] }
  0x8d   : > { %v530_v45 = vpop.permute.xlu1 %529  ;;  %618 = vmatprep.subr.mxu0 %v560_v41  ;;  %v528_v46 = vpop.permute.xlu0 %527  ;;  %2137 = vmatprep.subr.mxu1 %v732_v37  ;;  %v730_v41 = vld [vmem:[%s3150_s4 + $0xe0] sm:$0xff] }
  0x8e   : > { %v532_v47 = vsel %vm531_vm3, %v528_v46, %v530_v45  ;;  %v533_v48 = vsel %vm531_vm3, %v530_v45, %v528_v46  ;;  %619 = vmatpush1.msra.mxu0 %v559_v40  ;;  %2138 = vmatpush3.msra.mxu1 %v716_v38  ;;  %v715_v40 = vld [vmem:[%s3150_s4 + $0x68] sm:$0xff]  ;;  %v714_v45 = vld [vmem:[%s3150_s4 + $0x60] sm:$0xff]  ;;  %v729_v46 = vld [vmem:[%s3150_s4 + $0xd8] sm:$0xff] }
  0x8f   : > { %v542_v51 = vmul.f32 %v2580_v35, %v532_v47  ;;  %v543_v52 = vmul.f32 %v2591_v42, %v533_v48  ;;  %2139 = vmatprep.subr.mxu1 %v731_v39  ;;  %v713_v47 = vld [vmem:[%s3150_s4 + $0x58] sm:$0xff]  ;;  %v728_v48 = vld [vmem:[%s3150_s4 + $0xd0] sm:$0xff] }
  0x90   : > { %2140 = vmatpush3.msra.mxu1 %v715_v40 }
  0x91   : > { %v503_v56 = vpop.permute.xlu1 %502  ;;  %620 = vmatprep.subr.mxu0 %v543_v52  ;;  %v501_v57 = vpop.permute.xlu0 %500  ;;  %2141 = vmatprep.subr.mxu1 %v730_v41  ;;  %v727_v52 = vld [vmem:[%s3150_s4 + $0xc8] sm:$0xff] }
  0x92   : > { %v505_v58 = vsel %vm504_vm4, %v501_v57, %v503_v56  ;;  %v506_v59 = vsel %vm504_vm4, %v503_v56, %v501_v57  ;;  %621 = vmatpush1.msra.mxu0 %v542_v51  ;;  %2142 = vmatpush3.msra.mxu1 %v714_v45  ;;  %v712_v51 = vld [vmem:[%s3150_s4 + $0x50] sm:$0xff]  ;;  %v725_v56 = vld [vmem:[%s3150_s4 + $0xb8] sm:$0xff] }
  0x93   : > { %v515_v61 = vmul.f32 %v2605_v49, %v506_v59  ;;  %v516_v62 = vmul.f32 %v2608_v50, %v505_v58  ;;  %622 = vmatprep.subr.mxu0 %v526_v53  ;;  %2143 = vmatprep.subr.mxu1 %v729_v46  ;;  %v711_v53 = vld [vmem:[%s3150_s4 + $0x48] sm:$0xff]  ;;  %v709_v57 = vld [vmem:[%s3150_s4 + $0x38] sm:$0xff]  ;;  %v724_v58 = vld [vmem:[%s3150_s4 + $0xb0] sm:$0xff] }
  0x94   : > { %623 = vmatpush1.msra.mxu0 %v525_v55  ;;  %2144 = vmatpush3.msra.mxu1 %v713_v47  ;;  %v710_v55 = vld [vmem:[%s3150_s4 + $0x40] sm:$0xff]  ;;  %v708_v59 = vld [vmem:[%s3150_s4 + $0x30] sm:$0xff] }
  0x95   : > { %v486_v1 = vpop.permute.xlu1 %485  ;;  %v484_v5 = vpop.permute.xlu0 %483  ;;  %624 = vmatprep.subr.mxu0 %v516_v62  ;;  %2145 = vmatprep.subr.mxu1 %v728_v48  ;;  %v722_v62 = vld [vmem:[%s3150_s4 + $0xa0] sm:$0xff] }
  0x96   : > { %v488_v7 = vsel %vm487_vm5, %v484_v5, %v486_v1  ;;  %v489_v10 = vsel %vm487_vm5, %v486_v1, %v484_v5  ;;  %625 = vmatpush1.msra.mxu0 %v515_v61  ;;  %2146 = vmatpush3.msra.mxu1 %v712_v51  ;;  %v707_v61 = vld [vmem:[%s3150_s4 + $0x28] sm:$0xff]  ;;  %v706_v1 = vld [vmem:[%s3150_s4 + $0x20] sm:$0xff]  ;;  %v721_v5 = vld [vmem:[%s3150_s4 + $0x98] sm:$0xff]  ;;  %v2384_v51 = vmov 5  }
  0x97   : > { %v498_v12 = vmul.f32 %v2626_v63, %v489_v10  ;;  %v499_v13 = vmul.f32 %v2629_v0, %v488_v7  ;;  %2147 = vmatprep.subr.mxu1 %v727_v52  ;;  %v705_v7 = vld [vmem:[%s3150_s4 + $0x18] sm:$0xff]  ;;  %v720_v10 = vld [vmem:[%s3150_s4 + $0x90] sm:$0xff]  ;;  %v2785_v52 = vld [vmem:[%s3154_s8] sm:$0xff] }
  0x98   : > { %2148 = vmatpush3.msra.mxu1 %v711_v53 }
  0x99   : > { %v469_v18 = vpop.permute.xlu1 %468  ;;  %v467_v19 = vpop.permute.xlu0 %466  ;;  %626 = vmatprep.subr.mxu0 %v499_v13  ;;  %2149 = vmatprep.subr.mxu1 %v726_v54  ;;  %v719_v13 = vld [vmem:[%s3150_s4 + $0x88] sm:$0xff] }
  0x9a   : > { %v471_v22 = vsel %vm470_vm6, %v467_v19, %v469_v18  ;;  %v472_v23 = vsel %vm470_vm6, %v469_v18, %v467_v19  ;;  %627 = vmatpush1.msra.mxu0 %v498_v12  ;;  %2150 = vmatpush3.msra.mxu1 %v710_v55  ;;  %v704_v12 = vld [vmem:[%s3150_s4 + $0x10] sm:$0xff]  ;;  %v718_v18 = vld [vmem:[%s3150_s4 + $0x80] sm:$0xff] }
  0x9b   : > { %v481_v24 = vmul.f32 %v2637_v11, %v472_v23  ;;  %v482_v25 = vmul.f32 %v2642_v16, %v471_v22  ;;  %2151 = vmatprep.subr.mxu1 %v725_v56  ;;  %v702_v19 = vld [vmem:[%s3150_s4] sm:$0xff]  ;;  %v2380_v22 = vmov 2   ;;  %v2381_v23 = vmov 3  }
  0x9c   : > { %2152 = vmatpush3.msra.mxu1 %v709_v57  ;;  %2290 = vset.pattern.permute.xlu0 %v2380_v22  ;;  %v2386_v57 = vmov 6  }
  0x9d   : > { %v450_v28 = vpop.permute.xlu1 %449  ;;  %v448_v29 = vpop.permute.xlu0 %447  ;;  %628 = vmatprep.subr.mxu0 %v482_v25  ;;  %2153 = vmatprep.subr.mxu1 %v724_v58  ;;  %v2383_v25 = vmov 7   ;;  %v2387_v58 = vmov 8  }
  0x9e   : > { %v454_v31 = vsel %vm453_vm7, %v448_v29, %v450_v28  ;;  %v455_v32 = vsel %vm453_vm7, %v450_v28, %v448_v29  ;;  %629 = vmatpush1.msra.mxu0 %v481_v24  ;;  %2154 = vmatpush3.msra.mxu1 %v708_v59  ;;  %v2382_v24 = vmov 4  }
  0x9f   : > { %v464_v33 = vmul.f32 %v2653_v26, %v455_v32  ;;  %v465_v34 = vmul.f32 %v2656_v8, %v454_v31  ;;  %2155 = vmatprep.subr.mxu1 %v723_v60  ;;  %2291 = vset.pattern.permute.xlu1 %v2381_v23 }
  0xa0   : > { %2156 = vmatpush3.msra.mxu1 %v707_v61  ;;  %837 = vperm.xlu0 %2290, %v2527_v6  }
  0xa1   : > { %630 = vmatprep.subr.mxu0 %v465_v34  ;;  %2157 = vmatprep.subr.mxu1 %v722_v62 }
  0xa2   : > { %631 = vmatpush1.msra.mxu0 %v464_v33  ;;  %2158 = vmatpush3.msra.mxu1 %v706_v1 }
  0xa3   : > { %2106 = vmatmul.mubr.msk.f32.vlgmr.msra.gmra.mxu0 %vm596_vm8, %v595_v15  ;;  %2217 = vmatprep.subr.mxu0 %v2374_v2 }
  0xa4   : > { %2159 = vmatprep.subr.mxu1 %v721_v5  ;;  %847 = vperm.xlu1 %2291, %v2527_v6  }
  0xa5   : > { %2160 = vmatpush3.msra.mxu1 %v705_v7  ;;  %2292 = vset.pattern.permute.xlu0 %v2382_v24 }
  0xa6   : > { %2161 = vmatprep.subr.mxu1 %v720_v10  ;;  %857 = vperm.xlu0 %2292, %v2527_v6  }
  0xa7   : > { %2162 = vmatpush3.msra.mxu1 %v704_v12  ;;  %2219 = vmatprep.mubr.msk.f32.mxu0 %vm2396_vm12, %v2374_v2 }
  0xa8   : > { %2163 = vmatprep.subr.mxu1 %v719_v13  ;;  %2293 = vset.pattern.permute.xlu1 %v2384_v51 }
  0xa9   : > { %2164 = vmatpush3.msra.mxu1 %v703_v17 }
  0xaa   : > { %2165 = vmatprep.subr.mxu1 %v718_v18  ;;  %2295 = vset.pattern.permute.xlu0 %v2383_v25  ;;  %v675_v28 = vpop.permute.xlu0 %674  ;;  %v681_v32 = vpop.permute.xlu1 %680 }
  0xab   : > { %2166 = vmatpush3.msra.mxu1 %v702_v19  ;;  %887 = vperm.xlu0 %2295, %v2527_v6  }
  0xae   : > { %v2795_v59 = vpop.permute.xlu1 %827 }
  0xaf   : > { %2298 = vset.pattern.permute.xlu0 %v2377_v4 }
  0xb0   : > { %815 = vperm.xlu0 %2298, %v2785_v52  }
 0x11b   : > { %v838_v5 = vpop.permute.xlu0 %837 }
 0x11f   : > { %v2797_v60 = vpop.permute.xlu1 %847 }
 0x121   : > { %v858_v12 = vpop.permute.xlu0 %857 }
 0x126   : > { %v888_v19 = vpop.permute.xlu0 %887 }
 0x163   : > { %v666_v29 = vpop.f32.mrf.mxu0 }
 0x164   : > { %v677_v31 = vmul.f32 %v675_v28, %v666_v29 }
 0x165   : > { %v668_v33 = vpop.f32.mrf.mxu0 }
 0x166   : > { %v683_v34 = vadd.f32 %v681_v32, %v677_v31  ;;  %v678_v15 = vmul.f32 %v675_v28, %v668_v33 }
 0x168   : > { %v2107_v14 = vmul.f32 -1.442695, %v683_v34  ;;  %v684_v36 = vadd.f32 %v681_v32, %v678_v15 }
 0x16a   : > { %2313 = vpow2.f32 %v2107_v14  ;;  %v2108_v37 = vmul.f32 -1.442695, %v684_v36  ;;  %v816_v14 = vpop.permute.xlu0 %815 }
 0x16c   : > { %2315 = vpow2.f32 %v2108_v37 }
 0x177   : > { %v2314_v38 = vpop.eup %2313 }
 0x178   : > { %v691_v39 = vadd.f32 1.0, %v2314_v38 }
 0x179   : > { %v2316_v40 = vpop.eup %2315 }
 0x17a   : > { %v692_v41 = vadd.f32 1.0, %v2316_v40  ;;  %2317 = vrcp.f32 %v691_v39 }
 0x17c   : > { %2319 = vrcp.f32 %v692_v41 }
 0x187   : > { %v2318_v45 = vpop.eup %2317 }
 0x188   : > { %v2776_v48 = vmul.f32 %v2318_v45, %v683_v34 }
 0x189   : > { %v2320_v46 = vpop.eup %2319 }
 0x18a   : > { %v2774_v47 = vmul.f32 %v2320_v46, %v684_v36 }
 0x18c   : > { %798 = vmatprep.mubr.f32.mxu1 %v2774_v47 }
 0x18d   : > { %799 = vmatmul.mubr.f32.vlgmr.msra.gmra.mxu1 %v2776_v48 }
 0x18e   : > { %1402 = vmatprep.mubr.f32.mxu1 %v2374_v2 }
 0x24d   : > { %v2167_v53 = vpop.f32.mrf.mxu1 }
 0x24f   : > { %v2168_v54 = vpop.f32.mrf.mxu1 }
 0x250   : > { %v2169_v55 = vadd.f32 %v2168_v54, %v2167_v53 }
 0x252   : > { %v804_v56 = vmul.f32 0.071428575, %v2169_v55 }
 0x254   : > { %806 = vrot.lane.b32.xlu1 %v804_v56, %s2385_s21 }
 0x258   : > { %867 = vperm.xlu1 %2293, %v2527_v6  }
 0x25c   : > { %2294 = vset.pattern.permute.xlu1 %v2386_v57 }
 0x25d   : > { %877 = vperm.xlu1 %2294, %v2527_v6  }
 0x261   : > { %2296 = vset.pattern.permute.xlu1 %v2387_v58 }
 0x262   : > { %897 = vperm.xlu1 %2296, %v2527_v6  }
 0x266   : > { %2297 = vset.pattern.permute.xlu1 %v2377_v4 }
 0x267   : > { %821 = vperm.xlu1 %2297, %v2527_v6  }
 0x2c6   : > { %v807_v61 = vpop.permute.xlu1 %806 }
 0x2c7   : > { %v810_v62 = vsel %vm809_vm9, 0.0, %v807_v61 }
 0x2c8   : > { %v812_v1 = vsel %vm811_vm10, %v810_v62, 0.0 }
 0x2c9   : > { %v850_v7 = vmul.f32 %v2797_v60, %v812_v1  ;;  %v830_v10 = vmul.f32 %v2795_v59, %v812_v1  ;;  %v840_v6 = vmul.f32 %v838_v5, %v812_v1  ;;  %v860_v13 = vmul.f32 %v858_v12, %v812_v1 }
 0x2ca   : > { %v890_v28 = vmul.f32 %v888_v19, %v812_v1 }
 0x2cb   : > { %852 = vrot.lane.b32.xlu0 %v850_v7, %s2388_s28  ;;  %832 = vrot.lane.b32.xlu1 %v830_v10, %s2372_s17 }
 0x2cf   : > { %842 = vrot.lane.b32.xlu1 %v840_v6, %s2389_s19 }
 0x2d3   : > { %862 = vrot.lane.b32.xlu1 %v860_v13, %s2390_s20  ;;  %v2807_v17 = vpop.permute.xlu1 %867 }
 0x2d4   : > { %v870_v18 = vmul.f32 %v2807_v17, %v812_v1 }
 0x2d6   : > { %872 = vrot.lane.b32.xlu0 %v870_v18, %s2391_s29 }
 0x2d8   : > { %v2811_v29 = vpop.permute.xlu1 %877 }
 0x2d9   : > { %v880_v31 = vmul.f32 %v2811_v29, %v812_v1 }
 0x2da   : > { %892 = vrot.lane.b32.xlu0 %v890_v28, %s2392_s30 }
 0x2db   : > { %882 = vrot.lane.b32.xlu1 %v880_v31, %s2393_s22 }
 0x2dd   : > { %v898_v32 = vpop.permute.xlu1 %897 }
 0x2de   : > { %v900_v33 = vmul.f32 %v898_v32, %v812_v1 }
 0x2e0   : > { %902 = vrot.lane.b32.xlu1 %v900_v33, %s2394_s23 }
 0x2e2   : > { %v822_v34 = vpop.permute.xlu1 %821 }
 0x2e3   : > { %v824_v15 = vmul.f32 %v822_v34, %v812_v1 }
 0x2e4   : > { %1090 = vrot.lane.b32.xlu1 %v804_v56, %s2395_s24 }
 0x2e5   : > { %v825_v37 = vadd.f32 %v824_v15, %v816_v14 }
 0x33d   : > { %v833_v36 = vpop.permute.xlu1 %832  ;;  %v853_v41 = vpop.permute.xlu0 %852 }
 0x33e   : > { %v835_v38 = vadd.f32 %v833_v36, %v825_v37 }
 0x341   : > { %v843_v39 = vpop.permute.xlu1 %842 }
 0x342   : > { %v845_v40 = vadd.f32 %v843_v39, %v835_v38 }
 0x344   : > { %v855_v45 = vadd.f32 %v853_v41, %v845_v40 }
 0x345   : > { %v863_v46 = vpop.permute.xlu1 %862 }
 0x346   : > { %v865_v53 = vadd.f32 %v863_v46, %v855_v45 }
 0x348   : > { %v873_v54 = vpop.permute.xlu0 %872 }
 0x349   : > { %v875_v55 = vadd.f32 %v873_v54, %v865_v53 }
 0x34c   : > { %v893_v7 = vpop.permute.xlu0 %892 }
 0x34d   : > { %v883_v61 = vpop.permute.xlu1 %882 }
 0x34e   : > { %v885_v62 = vadd.f32 %v883_v61, %v875_v55 }
 0x350   : > { %v895_v10 = vadd.f32 %v893_v7, %v885_v62 }
 0x352   : > { %v903_v6 = vpop.permute.xlu1 %902 }
 0x353   : > { %v905_v56 = vadd.f32 %v903_v6, %v895_v10 }
 0x355   : > { %v907_v1 = vsel %vm906_vm11, %v905_v56, 0.0 }
 0x356   : > { %908 = vadd.xlane.f32.xlu0 %v907_v1  ;;  %v1091_v13 = vpop.permute.xlu1 %1090 }
 0x357   : > { %v1093_v18 = vsel %vm809_vm9, 0.0, %v1091_v13 }
 0x358   : > { %v1094_v28 = vsel %vm811_vm10, %v1093_v18, 0.0 }
 0x359   : > { %v1097_v31 = vmul.f32 %v1094_v28, %v2795_v59  ;;  %v1103_v33 = vmul.f32 %v1094_v28, %v838_v5  ;;  %v1109_v15 = vmul.f32 %v1094_v28, %v2797_v60  ;;  %v1115_v36 = vmul.f32 %v1094_v28, %v858_v12  ;;  %v2832_v59 = vld [vmem:[%s3155_s9] sm:$0xff] }
 0x35a   : > { %v1133_v37 = vmul.f32 %v1094_v28, %v888_v19  ;;  %v1121_v38 = vmul.f32 %v1094_v28, %v2807_v17  ;;  %v1127_v39 = vmul.f32 %v1094_v28, %v2811_v29  ;;  %v1139_v40 = vmul.f32 %v1094_v28, %v898_v32 }
 0x35b   : > { %1099 = vrot.lane.b32.xlu1 %v1097_v31, %s2372_s17  ;;  %v1095_v53 = vmul.f32 %v1094_v28, %v822_v34 }
 0x35d   : > { %v1096_v55 = vadd.f32 %v1095_v53, %v816_v14  ;;  %v1326_v53 = vld [vmem:[%s3151_s5 + $0x10] sm:$0x3f] }
 0x35f   : > { %1105 = vrot.lane.b32.xlu1 %v1103_v33, %s2389_s19 }
 0x363   : > { %1111 = vrot.lane.b32.xlu1 %v1109_v15, %s2388_s28 }
 0x367   : > { %1117 = vrot.lane.b32.xlu1 %v1115_v36, %s2390_s20  ;;  %s3166_s20 = smov 13  }
 0x36c   : > { %1135 = vrot.lane.b32.xlu0 %v1133_v37, %s2392_s30 }
 0x3cd   : > { %v1100_v41 = vpop.permute.xlu1 %1099 }
 0x3ce   : > { %v1102_v61 = vadd.f32 %v1100_v41, %v1096_v55  ;;  %v1324_v55 = vld [vmem:[%s3151_s5] sm:$0xff] }
 0x3d1   : > { %v1106_v45 = vpop.permute.xlu1 %1105 }
 0x3d2   : > { %v1108_v7 = vadd.f32 %v1106_v45, %v1102_v61 }
 0x3d5   : > { %v1112_v46 = vpop.permute.xlu1 %1111 }
 0x3d6   : > { %v1114_v17 = vadd.f32 %v1112_v46, %v1108_v7 }
 0x3d9   : > { %v1118_v54 = vpop.permute.xlu1 %1117 }
 0x3da   : > { %v1120_v1 = vadd.f32 %v1118_v54, %v1114_v17  ;;  %v1325_v54 = vld [vmem:[%s3151_s5 + $0x8] sm:$0xff] }
 0x3df   : > { %v909_v5 = vpop.xlane.xlu0 %908 }
 0x3e0   : > { %2218 = vmatpush3.msra.mxu0 %v909_v5 }
 0x3e1   : > { %2220 = vmatmul.mubr.msk.f32.vlgmr.msra.gmra.mxu0 %vm910_vm13, %v2832_v59  ;;  %2222 = vmatprep.subr.mxu0 %v2374_v2 }
 0x3e2   : > { %2224 = vmatprep.mubr.msk.f32.mxu0 %vm2396_vm12, %v2374_v2 }
 0x3e3   : > { %v1136_v34 = vpop.permute.xlu0 %1135 }
 0x4a1   : > { %v980_v60 = vpop.f32.mrf.mxu0 }
 0x4a2   : > { %v984_v12 = vmul.f32 0.071428575, %v980_v60 }
 0x4a3   : > { %v2221_v19 = vpop.f32.mrf.mxu0 }
 0x4a4   : > { %987 = vperm.xlu1 %2297, %v984_v12  }
 0x4a8   : > { %1123 = vrot.lane.b32.xlu1 %v1121_v38, %s2391_s29  ;;  %s3168_s29 = smov 15  }
 0x4ac   : > { %1129 = vrot.lane.b32.xlu1 %v1127_v39, %s2393_s22 }
 0x4b0   : > { %1141 = vrot.lane.b32.xlu1 %v1139_v40, %s2394_s23 }
 0x51f   : > { %v988_v62 = vpop.permute.xlu1 %987 }
 0x520   : > { %v2844_v10 = vsub.f32 %v905_v56, %v988_v62 }
 0x522   : > { %v991_v29 = vmul.f32 %v2844_v10, %v2844_v10 }
 0x523   : > { %v1124_v6 = vpop.permute.xlu1 %1123 }
 0x524   : > { %v992_v32 = vsel %vm906_vm11, %v991_v29, 0.0  ;;  %v1126_v13 = vadd.f32 %v1124_v6, %v1120_v1 }
 0x525   : > { %993 = vadd.xlane.f32.xlu1 %v992_v32 }
 0x527   : > { %v1130_v18 = vpop.permute.xlu1 %1129 }
 0x528   : > { %v1132_v31 = vadd.f32 %v1130_v18, %v1126_v13 }
 0x52a   : > { %v1138_v28 = vadd.f32 %v1136_v34, %v1132_v31 }
 0x52b   : > { %v1142_v14 = vpop.permute.xlu1 %1141 }
 0x52c   : > { %v1144_v33 = vadd.f32 %v1142_v14, %v1138_v28 }
 0x52e   : > { %v1145_v15 = vsel %vm906_vm11, %v1144_v33, 0.0 }
 0x52f   : > { %1146 = vadd.xlane.f32.xlu0 %v1145_v15  ;;  %v1410_v15 = vld [vmem:[%s3152_s6 + $0x8] sm:$0xff] }
 0x5ae   : > { %v994_v56 = vpop.xlane.xlu1 %993 }
 0x5af   : > { %2223 = vmatpush3.msra.mxu0 %v994_v56  ;;  %v1512_v56 = vld [vmem:[%s3156_s10 + $0x78] sm:$0xff] }
 0x5b0   : > { %2225 = vmatmul.mubr.msk.f32.vlgmr.msra.gmra.mxu0 %vm910_vm13, %v2832_v59  ;;  %2227 = vmatprep.subr.mxu0 %v2374_v2 }
 0x5b1   : > { %2229 = vmatprep.mubr.msk.f32.mxu0 %vm2396_vm12, %v2374_v2 }
 0x5b8   : > { %v1147_v36 = vpop.xlane.xlu0 %1146 }
 0x5b9   : > { %2228 = vmatpush3.msra.mxu0 %v1147_v36  ;;  %v1527_v36 = vld [vmem:[%s3156_s10 + $0xf0] sm:$0xff] }
 0x5ba   : > { %2230 = vmatmul.mubr.msk.f32.vlgmr.msra.gmra.mxu0 %vm910_vm13, %v2832_v59  ;;  %2232 = vmatprep.subr.mxu0 %v2374_v2 }
 0x5bb   : > { %2234 = vmatprep.mubr.msk.f32.mxu0 %vm2396_vm12, %v2374_v2 }
 0x670   : > { %v1061_v37 = vpop.f32.mrf.mxu0 }
 0x671   : > { %v1065_v45 = vmul.f32 0.071428575, %v1061_v37  ;;  %v1511_v37 = vld [vmem:[%s3156_s10 + $0x70] sm:$0xff] }
 0x672   : > { %v2226_v5 = vpop.f32.mrf.mxu0 }
 0x673   : > { %v1066_v46 = vadd.f32 1e-05, %v1065_v45  ;;  %v1526_v5 = vld [vmem:[%s3156_s10 + $0xe8] sm:$0xff]  ;;  %v1507_v45 = vld [vmem:[%s3156_s10 + $0x50] sm:$0xff] }
 0x675   : > { %2321 = vrsqrt.f32 %v1066_v46  ;;  %v1522_v46 = vld [vmem:[%s3156_s10 + $0xc8] sm:$0xff] }
 0x67a   : > { %v1214_v60 = vpop.f32.mrf.mxu0 }
 0x67b   : > { %v1218_v12 = vmul.f32 0.071428575, %v1214_v60  ;;  %v1510_v60 = vld [vmem:[%s3156_s10 + $0x68] sm:$0xff] }
 0x67c   : > { %v2231_v19 = vpop.f32.mrf.mxu0 }
 0x67d   : > { %1221 = vperm.xlu1 %2297, %v1218_v12   ;;  %v1525_v12 = vld [vmem:[%s3156_s10 + $0xe0] sm:$0xff] }
 0x67e   : > { %v1509_v19 = vld [vmem:[%s3156_s10 + $0x60] sm:$0xff] }
 0x681   : > { %2299 = vset.pattern.permute.xlu1 %v2376_v3 }
 0x682   : > { %1075 = vperm.xlu1 %2299, %v2785_v52  }
 0x686   : > { %2300 = vset.pattern.permute.xlu1 %v2380_v22  ;;  %v2322_v22 = vpop.eup %2321 }
 0x687   : > { %1080 = vperm.xlu1 %2300, %v2785_v52  }
 0x68b   : > { %2301 = vset.pattern.permute.xlu1 %v2381_v23  ;;  %v1327_v23 = vld [vmem:[%s3151_s5 + $0x18] sm:$0x3f] }
 0x68c   : > { %1309 = vperm.xlu1 %2301, %v2785_v52   ;;  %2115 = vmatprep.subr.msk.mxu1 %vm1331_vm14, %v1327_v23  ;;  %v1521_v23 = vld [vmem:[%s3156_s10 + $0xc0] sm:$0xff] }
 0x68d   : > { %2116 = vmatpush1.msk.msra.mxu1 %vm1331_vm14, %v1326_v53  ;;  %v1505_v53 = vld [vmem:[%s3156_s10 + $0x40] sm:$0xff] }
 0x68e   : > { %1368 = vmatprep.subr.mxu1 %v1325_v54  ;;  %v1520_v54 = vld [vmem:[%s3156_s10 + $0xb8] sm:$0xff] }
 0x68f   : > { %1369 = vmatpush1.msra.mxu1 %v1324_v55  ;;  %v1504_v55 = vld [vmem:[%s3156_s10 + $0x38] sm:$0xff] }
 0x690   : > { %2302 = vset.pattern.permute.xlu1 %v2377_v4 }
 0x6f8   : > { %v1222_v38 = vpop.permute.xlu1 %1221 }
 0x6f9   : > { %v2867_v39 = vsub.f32 %v1144_v33, %v1222_v38  ;;  %v1411_v33 = vld [vmem:[%s3152_s6 + $0x10] sm:$0x3f]  ;;  %v1524_v38 = vld [vmem:[%s3156_s10 + $0xd8] sm:$0xff] }
 0x6fb   : > { %v1225_v40 = vmul.f32 %v2867_v39, %v2867_v39 }
 0x6fd   : > { %v1226_v41 = vsel %vm906_vm11, %v1225_v40, 0.0  ;;  %v1076_v61 = vpop.permute.xlu1 %1075  ;;  %v1508_v40 = vld [vmem:[%s3156_s10 + $0x58] sm:$0xff] }
 0x6fe   : > { %1227 = vadd.xlane.f32.xlu0 %v1226_v41  ;;  %v1523_v41 = vld [vmem:[%s3156_s10 + $0xd0] sm:$0xff] }
 0x702   : > { %v1081_v17 = vpop.permute.xlu1 %1080 }
 0x714   : > { %1070 = vperm.xlu0 %2298, %v2322_v22   ;;  %v1506_v22 = vld [vmem:[%s3156_s10 + $0x48] sm:$0xff] }
 0x718   : > { %2304 = vset.pattern.permute.xlu0 %v2384_v51 }
 0x787   : > { %v1228_v51 = vpop.xlane.xlu0 %1227 }
 0x788   : > { %2233 = vmatpush3.msra.mxu0 %v1228_v51  ;;  %v1519_v51 = vld [vmem:[%s3156_s10 + $0xb0] sm:$0xff] }
 0x789   : > { %2235 = vmatmul.mubr.msk.f32.vlgmr.msra.gmra.mxu0 %vm910_vm13, %v2832_v59 }
 0x78a   : > { %1486 = vmatprep.mubr.f32.mxu0 %v2374_v2 }
 0x78f   : > { %v1071_v62 = vpop.permute.xlu0 %1070 }
 0x790   : > { %v1073_v7 = vmul.f32 %v1071_v62, %v2844_v10  ;;  %v1412_v10 = vld [vmem:[%s3152_s6 + $0x18] sm:$0x3f]  ;;  %v1518_v62 = vld [vmem:[%s3156_s10 + $0xa8] sm:$0xff] }
 0x791   : > { %2118 = vmatprep.subr.msk.mxu0 %vm1331_vm14, %v1412_v10 }
 0x792   : > { %v1078_v29 = vmul.f32 %v1076_v61, %v1073_v7  ;;  %2119 = vmatpush1.msk.msra.mxu0 %vm1331_vm14, %v1411_v33  ;;  %v1503_v61 = vld [vmem:[%s3156_s10 + $0x30] sm:$0xff]  ;;  %v1502_v7 = vld [vmem:[%s3156_s10 + $0x28] sm:$0xff] }
 0x793   : > { %1452 = vmatprep.subr.mxu0 %v1410_v15  ;;  %v1515_v15 = vld [vmem:[%s3156_s10 + $0x90] sm:$0xff] }
 0x794   : > { %v1083_v6 = vadd.f32 %v1081_v17, %v1078_v29  ;;  %v1517_v17 = vld [vmem:[%s3156_s10 + $0xa0] sm:$0xff] }
 0x795   : > { %v1501_v29 = vld [vmem:[%s3156_s10 + $0x20] sm:$0xff] }
 0x796   : > { %v2111_v1 = vmul.f32 -1.442695, %v1083_v6  ;;  %v1516_v6 = vld [vmem:[%s3156_s10 + $0x98] sm:$0xff] }
 0x798   : > { %2323 = vpow2.f32 %v2111_v1  ;;  %v1500_v1 = vld [vmem:[%s3156_s10 + $0x18] sm:$0xff] }
 0x7a5   : > { %v2324_v32 = vpop.eup %2323 }
 0x7a6   : > { %v1087_v13 = vadd.f32 1.0, %v2324_v32  ;;  %v1310_v32 = vpop.permute.xlu1 %1309 }
 0x7a8   : > { %2325 = vrcp.f32 %v1087_v13 }
 0x7b5   : > { %v2326_v18 = vpop.eup %2325 }
 0x7b6   : > { %2117 = vmatmul.mubr.msk.f32.vlgmr.msra.gmra.mxu1 %vm906_vm11, %v2326_v18 }
 0x849   : > { %v1295_v31 = vpop.f32.mrf.mxu0 }
 0x84a   : > { %v1299_v34 = vmul.f32 0.071428575, %v1295_v31 }
 0x84b   : > { %v2236_v59 = vpop.f32.mrf.mxu0 }
 0x84c   : > { %v1300_v28 = vadd.f32 1e-05, %v1299_v34 }
 0x84e   : > { %2327 = vrsqrt.f32 %v1300_v28 }
 0x85b   : > { %v2328_v14 = vpop.eup %2327 }
 0x85c   : > { %1304 = vperm.xlu1 %2302, %v2328_v14  }
 0x860   : > { %2303 = vset.pattern.permute.xlu1 %v2382_v24  ;;  %v1409_v24 = vld [vmem:[%s3152_s6] sm:$0xff] }
 0x861   : > { %1314 = vperm.xlu1 %2303, %v2785_v52   ;;  %1453 = vmatpush1.msra.mxu0 %v1409_v24  ;;  %v1514_v24 = vld [vmem:[%s3156_s10 + $0x88] sm:$0xff] }
 0x862   : > { %2237 = vmatprep.subr.mxu0 %v2374_v2 }
 0x865   : > { %2305 = vset.pattern.permute.xlu1 %v2386_v57  ;;  %v1528_v57 = vld [vmem:[%s3156_s10 + $0xf8] sm:$0xff] }
 0x866   : > { %2178 = vmatprep.subr.mxu1 %v1528_v57  ;;  %v1498_v57 = vld [vmem:[%s3156_s10 + $0x8] sm:$0xff] }
 0x867   : > { %2179 = vmatpush3.msra.mxu1 %v1512_v56  ;;  %v1513_v56 = vld [vmem:[%s3156_s10 + $0x80] sm:$0xff] }
 0x868   : > { %2180 = vmatprep.subr.mxu1 %v1527_v36  ;;  %v1497_v36 = vld [vmem:[%s3156_s10] sm:$0xff] }
 0x869   : > { %2181 = vmatpush3.msra.mxu1 %v1511_v37 }
 0x86a   : > { %2182 = vmatprep.subr.mxu1 %v1526_v5 }
 0x86b   : > { %2183 = vmatpush3.msra.mxu1 %v1510_v60 }
 0x86c   : > { %2184 = vmatprep.subr.mxu1 %v1525_v12 }
 0x86d   : > { %2185 = vmatpush3.msra.mxu1 %v1509_v19 }
 0x86e   : > { %2186 = vmatprep.subr.mxu1 %v1524_v38 }
 0x86f   : > { %2187 = vmatpush3.msra.mxu1 %v1508_v40 }
 0x870   : > { %2188 = vmatprep.subr.mxu1 %v1523_v41 }
 0x871   : > { %2189 = vmatpush3.msra.mxu1 %v1507_v45 }
 0x872   : > { %2190 = vmatprep.subr.mxu1 %v1522_v46 }
 0x873   : > { %2191 = vmatpush3.msra.mxu1 %v1506_v22 }
 0x874   : > { %2192 = vmatprep.subr.mxu1 %v1521_v23 }
 0x875   : > { %2193 = vmatpush3.msra.mxu1 %v1505_v53 }
 0x876   : > { %2194 = vmatprep.subr.mxu1 %v1520_v54  ;;  %v1404_v37 = vpop.f32.mrf.mxu1 }
 0x877   : > { %2195 = vmatpush3.msra.mxu1 %v1504_v55  ;;  %v1493_v19 = vmul.f32 %v1404_v37, %v2776_v48 }
 0x878   : > { %2196 = vmatprep.subr.mxu1 %v1519_v51  ;;  %v1406_v5 = vpop.f32.mrf.mxu1 }
 0x879   : > { %2197 = vmatpush3.msra.mxu1 %v1503_v61  ;;  %v1494_v12 = vmul.f32 %v1406_v5, %v2774_v47 }
 0x87a   : > { %2198 = vmatprep.subr.mxu1 %v1518_v62 }
 0x87b   : > { %2199 = vmatpush3.msra.mxu1 %v1502_v7 }
 0x87c   : > { %2200 = vmatprep.subr.mxu1 %v1517_v17 }
 0x87d   : > { %2201 = vmatpush3.msra.mxu1 %v1501_v29 }
 0x87e   : > { %2202 = vmatprep.subr.mxu1 %v1516_v6 }
 0x87f   : > { %2203 = vmatpush3.msra.mxu1 %v1500_v1 }
 0x880   : > { %2204 = vmatprep.subr.mxu1 %v1515_v15 }
 0x8d7   : > { %v1305_v13 = vpop.permute.xlu1 %1304 }
 0x8d8   : > { %v1307_v18 = vmul.f32 %v1305_v13, %v2867_v39  ;;  %v1499_v39 = vld [vmem:[%s3156_s10 + $0x10] sm:$0xff] }
 0x8d9   : > { %2205 = vmatpush3.msra.mxu1 %v1499_v39 }
 0x8da   : > { %v1312_v31 = vmul.f32 %v1310_v32, %v1307_v18  ;;  %2206 = vmatprep.subr.mxu1 %v1514_v24 }
 0x8db   : > { %2207 = vmatpush3.msra.mxu1 %v1498_v57 }
 0x8dc   : > { %v1315_v34 = vpop.permute.xlu1 %1314  ;;  %2208 = vmatprep.subr.mxu1 %v1513_v56 }
 0x8dd   : > { %v1317_v59 = vadd.f32 %v1315_v34, %v1312_v31  ;;  %2209 = vmatpush3.msra.mxu1 %v1497_v36 }
 0x8df   : > { %v2114_v28 = vmul.f32 -1.442695, %v1317_v59 }
 0x8e1   : > { %2329 = vpow2.f32 %v2114_v28 }
 0x8ee   : > { %v2330_v14 = vpop.eup %2329 }
 0x8ef   : > { %v1321_v10 = vadd.f32 1.0, %v2330_v14 }
 0x8f1   : > { %2331 = vrcp.f32 %v1321_v10 }
 0x8fe   : > { %v2332_v33 = vpop.eup %2331 }
 0x8ff   : > { %2120 = vmatmul.mubr.msk.f32.vlgmr.msra.gmra.mxu0 %vm906_vm11, %v2332_v33 }
 0x900   : > { %2239 = vmatprep.mubr.msk.f32.mxu0 %vm2396_vm12, %v2374_v2 }
 0x9bf   : > { %v1488_v60 = vpop.f32.mrf.mxu0 }
 0x9c0   : > { %v3014_v41 = vmul.f32 %v1493_v19, %v1488_v60  ;;  %v2397_v60 = vmov 9  }
 0x9c1   : > { %v1490_v38 = vpop.f32.mrf.mxu0 }
 0x9c2   : > { %v3012_v40 = vmul.f32 %v1494_v12, %v1490_v38 }
 0x9c4   : > { %1593 = vmatprep.mubr.f32.mxu1 %v3012_v40 }
 0x9c5   : > { %1594 = vmatmul.mubr.f32.vlgmr.msra.gmra.mxu1 %v3014_v41 }
 0xa85   : > { %v2210_v45 = vpop.f32.mrf.mxu1 }
 0xa87   : > { %v2211_v46 = vpop.f32.mrf.mxu1 }
 0xa88   : > { %v2212_v22 = vadd.f32 %v2211_v46, %v2210_v45 }
 0xa8a   : > { %v1599_v23 = vmul.f32 0.020408163, %v2212_v22 }
 0xa8c   : > { %v1600_v53 = vsel %vm809_vm9, %v1599_v23, 0.0 }
 0xa8d   : > { %1601 = vadd.xlane.f32.xlu1 %v1600_v53 }
 0xa9e   : > { %1636 = vperm.xlu1 %2305, %v2785_v52  }
 0xaa2   : > { %2306 = vset.pattern.permute.xlu1 %v2387_v58 }
 0xaa3   : > { %1646 = vperm.xlu1 %2306, %v2785_v52  }
 0xaa7   : > { %2307 = vset.pattern.permute.xlu1 %v2383_v25 }
 0xaa8   : > { %1641 = vperm.xlu1 %2307, %v2785_v52  }
 0xaac   : > { %2308 = vset.pattern.permute.xlu1 %v2397_v60 }
 0xb16   : > { %v1602_v47 = vpop.xlane.xlu1 %1601 }
 0xb17   : > { %v1603_v48 = vrot.slane %v1602_v47, 4 }
 0xb19   : > { %v1604_v54 = vadd.f32 %v1603_v48, %v1602_v47 }
 0xb1a   : > { %v1637_v10 = vpop.permute.xlu1 %1636 }
 0xb1b   : > { %v1605_v55 = vrot.slane %v1604_v54, 2 }
 0xb1d   : > { %v1606_v51 = vadd.f32 %v1605_v55, %v1604_v54 }
 0xb1e   : > { %v1647_v24 = vpop.permute.xlu1 %1646 }
 0xb1f   : > { %v1607_v61 = vrot.slane %v1606_v51, 1 }
 0xb21   : > { %v1608_v62 = vadd.f32 %v1607_v61, %v1606_v51 }
 0xb23   : > { %2247 = vpush %v1608_v62  ;;  %v1642_v37 = vpop.permute.xlu1 %1641 }
 0xb54   : > { %s2248_s28 = spop %2247 }
 0xb55   : > { %v1610_v7 = vstv %s2248_s28 }
 0xb56   : > { %v1612_v17 = vmul.f32 0.03125, %v1610_v7 }
 0xb58   : > { %v1613_v29 = vsub.f32 %v1599_v23, %v1612_v17 }
 0xb5a   : > { %v1614_v6 = vmul.f32 %v1613_v29, %v1613_v29 }
 0xb5c   : > { %v1615_v58 = vsel %vm809_vm9, %v1614_v6, 0.0 }
 0xb5d   : > { %1616 = vadd.xlane.f32.xlu0 %v1615_v58 }
 0xb73   : > { %1631 = vperm.xlu0 %2304, %v2785_v52  }
 0xb77   : > { %2309 = vset.pattern.permute.xlu0 %v2377_v4 }
 0xbe6   : > { %v1617_v25 = vpop.xlane.xlu0 %1616 }
 0xbe7   : > { %v1618_v1 = vrot.slane %v1617_v25, 4 }
 0xbe9   : > { %v1619_v32 = vadd.f32 %v1618_v1, %v1617_v25 }
 0xbeb   : > { %v1620_v13 = vrot.slane %v1619_v32, 2 }
 0xbed   : > { %v1621_v18 = vadd.f32 %v1620_v13, %v1619_v32 }
 0xbee   : > { %v1632_v15 = vpop.permute.xlu0 %1631 }
 0xbef   : > { %v1622_v31 = vrot.slane %v1621_v18, 1 }
 0xbf1   : > { %v1623_v34 = vadd.f32 %v1622_v31, %v1621_v18 }
 0xbf3   : > { %2249 = vpush %v1623_v34 }
 0xc24   : > { %s2250_s19 = spop %2249 }
 0xc25   : > { %v1625_v59 = vstv %s2250_s19 }
 0xc26   : > { %v1626_v28 = vmul.f32 0.03125, %v1625_v59  ;;  %v2359_v59 = vld [vmem:[%s3147_s1 + $0x10] ss:$0 sm:$0xff] }
 0xc28   : > { %v1627_v14 = vadd.f32 1e-05, %v1626_v28 }
 0xc2a   : > { %2333 = vrsqrt.f32 %v1627_v14  ;;  %v2360_v14 = vld [vmem:[%s3147_s1 + $0x18] ss:$0 sm:$0xff] }
 0xc37   : > { %v2334_v33 = vpop.eup %2333 }
 0xc38   : > { %v1629_v39 = vmul.f32 %v2334_v33, %v1613_v29 }
 0xc3a   : > { %v1634_v57 = vmul.f32 %v1632_v15, %v1629_v39 }
 0xc3c   : > { %v1639_v56 = vadd.f32 %v1637_v10, %v1634_v57 }
 0xc3e   : > { %v1649_v36 = vmul.f32 %v1647_v24, %v1639_v56  ;;  %v1644_v5 = vmul.f32 %v1642_v37, %v1639_v56 }
 0xc40   : > { %2238 = vmatpush3.xpose.msk.msra.mxu0 %vm809_vm9, %v1649_v36 }
 0xc41   : > { %2242 = vmatprep.subr.mxu0 %v2374_v2 }
 0xc43   : > { %2240 = vmatmul.mubr.msk.f32.vlgmr.msra.gmra.mxu0 %vm809_vm9, %v1644_v5 }
 0xc44   : > { %2244 = vmatprep.mubr.msk.f32.mxu0 %vm2396_vm12, %v2374_v2 }
 0xd03   : > { %v1727_v12 = vpop.f32.mrf.mxu0 }
 0xd04   : > { %v1731_v19 = vmul.f32 0.35355338, %v1727_v12 }
 0xd05   : > { %v2241_v38 = vpop.f32.mrf.mxu0 }
 0xd06   : > { %v1732_v45 = vsel %vm910_vm13, %v1731_v19, -inf }
 0xd07   : > { %1733 = vmax.xlane.f32.xlu1 %v1732_v45 }
 0xd18   : > { %1651 = vperm.xlu1 %2308, %v2785_v52  }
 0xd1c   : > { %2310 = vset.pattern.permute.xlu1 %v2377_v4 }
 0xd90   : > { %v1734_v46 = vpop.xlane.xlu1 %1733 }
 0xd91   : > { %v1735_v22 = vsub.f32 %v1731_v19, %v1734_v46 }
 0xd93   : > { %v1736_v23 = vmul.f32 1.442695, %v1735_v22 }
 0xd94   : > { %v1652_v53 = vpop.permute.xlu1 %1651 }
 0xd95   : > { %2335 = vpow2.f32 %v1736_v23  ;;  %v1654_v47 = vmul.f32 %v1652_v53, %v1639_v56 }
 0xd97   : > { %2243 = vmatpush3.msra.mxu0 %v1654_v47 }
 0xda2   : > { %v2336_v48 = vpop.eup %2335 }
 0xda3   : > { %v1738_v54 = vsel %vm910_vm13, %v2336_v48, 0.0 }
 0xda4   : > { %1739 = vadd.xlane.f32.xlu0 %v1738_v54 }
 0xe2d   : > { %v1740_v55 = vpop.xlane.xlu0 %1739 }
 0xe2e   : > { %2337 = vrcp.f32 %v1740_v55 }
 0xe3b   : > { %v2338_v51 = vpop.eup %2337 }
 0xe3c   : > { %v1742_v61 = vmul.f32 %v2338_v51, %v2336_v48 }
 0xe3e   : > { %2245 = vmatmul.mubr.msk.f32.vlgmr.msra.gmra.mxu0 %vm910_vm13, %v1742_v61 }
 0xe3f   : > { %1967 = vmatprep.mubr.f32.mxu0 %v2374_v2 }
 0xefe   : > { %v1812_v4 = vpop.f32.mrf.mxu0 }
 0xeff   : > { %v1816_v52 = vsel %vm809_vm9, %v1812_v4, 0.0 }
 0xf00   : > { %1817 = vadd.xlane.f32.xlu0 %v1816_v52  ;;  %v2246_v62 = vpop.f32.mrf.mxu0 }
 0xf89   : > { %v1818_v7 = vpop.xlane.xlu0 %1817 }
 0xf8a   : > { %v2124_v17 = vmul.f32 -0.25, %v1818_v7 }
 0xf8c   : > { %v1822_v29 = vmul.f32 1.442695, %v2124_v17 }
 0xf8e   : > { %2339 = vpow2.f32 %v1822_v29 }
 0xf9b   : > { %v2340_v6 = vpop.eup %2339 }
 0xf9c   : > { %v1824_v58 = vadd.f32 1.0, %v2340_v6 }
 0xf9e   : > { %2341 = vrcp.f32 %v1824_v58 }
 0xfab   : > { %v2342_v25 = vpop.eup %2341 }
 0xfac   : > { %v3040_v1 = vmul.f32 %v2342_v25, %v3014_v41  ;;  %v1828_v32 = vmul.f32 %v2342_v25, %v3012_v40  ;;  %v1980_v40 = vld [vmem:[%s3158_s12] sm:$0xff]  ;;  %v1981_v41 = vld [vmem:[%s3158_s12 + $0x8] sm:$0xff] }
 0xfae   : > { %1889 = vrot.lane.b32.xlu1 %v1828_v32, %s2370_s15  ;;  %1887 = vrot.lane.b32.xlu0 %v3040_v1, %s2370_s15  ;;  %s3167_s15 = smov 14   ;;  %v1861_v48 = vmul.f32 %v3040_v1, %v2597_v44 }
 0xfb2   : > { %1879 = vrot.lane.b32.xlu1 %v3040_v1, %s2369_s14  ;;  %1863 = vrot.lane.b32.xlu0 %v3040_v1, %s2372_s17 }
 0xfb6   : > { %1881 = vrot.lane.b32.xlu1 %v1828_v32, %s2369_s14  ;;  %1853 = vrot.lane.b32.xlu0 %v3040_v1, %s2373_s18 }
 0xfba   : > { %1871 = vrot.lane.b32.xlu1 %v3040_v1, %s2371_s16  ;;  %1845 = vrot.lane.b32.xlu0 %v3040_v1, %s3166_s20 }
 0xfbe   : > { %1873 = vrot.lane.b32.xlu1 %v1828_v32, %s2371_s16  ;;  %1837 = vrot.lane.b32.xlu0 %v3040_v1, %s3167_s15 }
 0xfc2   : > { %1865 = vrot.lane.b32.xlu1 %v1828_v32, %s2372_s17  ;;  %1829 = vrot.lane.b32.xlu0 %v3040_v1, %s3168_s29 }
 0xfc6   : > { %1855 = vrot.lane.b32.xlu1 %v1828_v32, %s2373_s18  ;;  %1984 = vperm.xlu0 %2309, %v1980_v40  }
 0xfca   : > { %1847 = vrot.lane.b32.xlu1 %v1828_v32, %s3166_s20  ;;  %2312 = vset.pattern.permute.xlu0 %v2376_v3  ;;  %s2134_s20 = sshll.u32 %s3170_s26, 5 }
 0xfcb   : > { %2001 = vperm.xlu0 %2312, %v1981_v41   ;;  %s440_s14 = scalar_lea.vmem %s3159_s13, %s2134_s20 }
 0xfce   : > { %1839 = vrot.lane.b32.xlu1 %v1828_v32, %s3167_s15 }
 0xfd2   : > { %1831 = vrot.lane.b32.xlu1 %v1828_v32, %s3168_s29 }
 0xfd6   : > { %1989 = vperm.xlu1 %2310, %v1981_v41  }
 0xfda   : > { %2311 = vset.pattern.permute.xlu1 %v2376_v3 }
 0xfdb   : > { %1997 = vperm.xlu1 %2311, %v1980_v40  }
0x1020   : > { %v1890_v13 = vpop.permute.xlu1 %1889  ;;  %v1888_v18 = vpop.permute.xlu0 %1887 }
0x1021   : > { %v1891_v31 = vsel %vm582_vm1, %v1888_v18, %v1890_v13  ;;  %v1892_v34 = vsel %vm582_vm1, %v1890_v13, %v1888_v18 }
0x1022   : > { %v1893_v28 = vmul.f32 %v2359_v59, %v1891_v31  ;;  %v1894_v10 = vmul.f32 %v2360_v14, %v1892_v34 }
0x1024   : > { %v1880_v3 = vpop.permute.xlu1 %1879  ;;  %1917 = vmatprep.subr.mxu0 %v1894_v10  ;;  %v1864_v56 = vpop.permute.xlu0 %1863 }
0x1025   : > { %1918 = vmatpush1.msra.mxu0 %v1893_v28 }
0x1028   : > { %v1882_v33 = vpop.permute.xlu1 %1881  ;;  %v1854_v12 = vpop.permute.xlu0 %1853 }
0x1029   : > { %v1883_v15 = vsel %vm565_vm0, %v1880_v3, %v1882_v33  ;;  %v1884_v39 = vsel %vm565_vm0, %v1882_v33, %v1880_v3 }
0x102a   : > { %v1885_v24 = vmul.f32 %v1883_v15, %v2570_v27  ;;  %v1886_v57 = vmul.f32 %v1884_v39, %v2559_v21 }
0x102c   : > { %v1872_v36 = vpop.permute.xlu1 %1871  ;;  %1919 = vmatprep.subr.mxu0 %v1886_v57  ;;  %v1846_v23 = vpop.permute.xlu0 %1845 }
0x102d   : > { %1920 = vmatpush1.msra.mxu0 %v1885_v24 }
0x1030   : > { %v1874_v37 = vpop.permute.xlu1 %1873  ;;  %v1838_v51 = vpop.permute.xlu0 %1837 }
0x1031   : > { %v1875_v5 = vsel %vm548_vm2, %v1872_v36, %v1874_v37  ;;  %v1876_v60 = vsel %vm548_vm2, %v1874_v37, %v1872_v36 }
0x1032   : > { %v1877_v19 = vmul.f32 %v1875_v5, %v2556_v20  ;;  %v1878_v38 = vmul.f32 %v1876_v60, %v2575_v30  ;;  %v1862_v20 = vmul.f32 %v1828_v32, %v2594_v43 }
0x1034   : > { %v1866_v45 = vpop.permute.xlu1 %1865  ;;  %1921 = vmatprep.subr.mxu0 %v1878_v38  ;;  %v1830_v7 = vpop.permute.xlu0 %1829 }
0x1035   : > { %v1867_v21 = vsel %vm531_vm3, %v1864_v56, %v1866_v45  ;;  %v1868_v27 = vsel %vm531_vm3, %v1866_v45, %v1864_v56  ;;  %1922 = vmatpush1.msra.mxu0 %v1877_v19 }
0x1036   : > { %v1869_v46 = vmul.f32 %v1867_v21, %v2580_v35  ;;  %v1870_v22 = vmul.f32 %v1868_v27, %v2591_v42 }
0x1038   : > { %v1856_v53 = vpop.permute.xlu1 %1855  ;;  %1923 = vmatprep.subr.mxu0 %v1870_v22 }
0x1039   : > { %v1857_v30 = vsel %vm504_vm4, %v1854_v12, %v1856_v53  ;;  %v1858_v47 = vsel %vm504_vm4, %v1856_v53, %v1854_v12  ;;  %1924 = vmatpush1.msra.mxu0 %v1869_v46 }
0x103a   : > { %v1859_v54 = vmul.f32 %v1858_v47, %v2605_v49  ;;  %v1860_v35 = vmul.f32 %v1857_v30, %v2608_v50  ;;  %1925 = vmatprep.subr.mxu0 %v1862_v20 }
0x103b   : > { %1926 = vmatpush1.msra.mxu0 %v1861_v48 }
0x103c   : > { %v1848_v42 = vpop.permute.xlu1 %1847  ;;  %1927 = vmatprep.subr.mxu0 %v1860_v35 }
0x103d   : > { %v1849_v43 = vsel %vm487_vm5, %v1846_v23, %v1848_v42  ;;  %v1850_v55 = vsel %vm487_vm5, %v1848_v42, %v1846_v23  ;;  %1928 = vmatpush1.msra.mxu0 %v1859_v54 }
0x103e   : > { %v1851_v61 = vmul.f32 %v1850_v55, %v2626_v63  ;;  %v1852_v44 = vmul.f32 %v1849_v43, %v2629_v0 }
0x1040   : > { %v1840_v4 = vpop.permute.xlu1 %1839  ;;  %1929 = vmatprep.subr.mxu0 %v1852_v44 }
0x1041   : > { %v1841_v49 = vsel %vm470_vm6, %v1838_v51, %v1840_v4  ;;  %v1842_v50 = vsel %vm470_vm6, %v1840_v4, %v1838_v51  ;;  %1930 = vmatpush1.msra.mxu0 %v1851_v61 }
0x1042   : > { %v1843_v52 = vmul.f32 %v1842_v50, %v2637_v11  ;;  %v1844_v62 = vmul.f32 %v1841_v49, %v2642_v16  ;;  %v1895_v11 = vld [vmem:[%s3157_s11] sm:$0xff] }
0x1044   : > { %v1832_v17 = vpop.permute.xlu1 %1831  ;;  %1931 = vmatprep.subr.mxu0 %v1844_v62 }
0x1045   : > { %v1833_v63 = vsel %vm453_vm7, %v1830_v7, %v1832_v17  ;;  %v1834_v0 = vsel %vm453_vm7, %v1832_v17, %v1830_v7  ;;  %1932 = vmatpush1.msra.mxu0 %v1843_v52 }
0x1046   : > { %v1835_v29 = vmul.f32 %v1834_v0, %v2653_v26  ;;  %v1836_v6 = vmul.f32 %v1833_v63, %v2656_v8  ;;  %v1985_v26 = vpop.permute.xlu0 %1984 }
0x1048   : > { %1933 = vmatprep.subr.mxu0 %v1836_v6 }
0x1049   : > { %1934 = vmatpush1.msra.mxu0 %v1835_v29 }
0x104a   : > { %2125 = vmatmul.mubr.msk.f32.vlgmr.msra.gmra.mxu0 %vm596_vm8, %v1895_v11  ;;  %v2002_v13 = vpop.permute.xlu0 %2001 }
0x104b   : > { %1973 = vmatprep.mubr.f32.mxu0 %v2374_v2 }
0x104e   : > { %2126 = vmatmul.mubr.msk.f32.gmra.mxu0 %vm596_vm8, %v1896_v9 }
0x1051   : > { %v1990_v16 = vpop.permute.xlu1 %1989 }
0x1056   : > { %v1998_v8 = vpop.permute.xlu1 %1997 }
0x110a   : > { %v1969_v58 = vpop.f32.mrf.mxu0 }
0x110b   : > { %v1992_v25 = vmul.f32 %v1985_v26, %v1969_v58 }
0x110c   : > { %v1971_v1 = vpop.f32.mrf.mxu0 }
0x110d   : > { %v2004_v32 = vadd.f32 %v1998_v8, %v1992_v25  ;;  %v1993_v40 = vmul.f32 %v1985_v26, %v1971_v1 }
0x110e   : > { %v1975_v41 = vpop.f32.mrf.mxu0 }
0x110f   : > { %v2127_v18 = vmul.f32 -1.442695, %v2004_v32  ;;  %v2005_v31 = vadd.f32 %v1998_v8, %v1993_v40  ;;  %v1994_v34 = vmul.f32 %v1990_v16, %v1975_v41 }
0x1110   : > { %v1977_v2 = vpop.f32.mrf.mxu0 }
0x1111   : > { %2343 = vpow2.f32 %v2127_v18  ;;  %v2128_v59 = vmul.f32 -1.442695, %v2005_v31  ;;  %v2006_v28 = vadd.f32 %v2002_v13, %v1994_v34  ;;  %v1995_v14 = vmul.f32 %v1990_v16, %v1977_v2 }
0x1113   : > { %2345 = vpow2.f32 %v2128_v59  ;;  %v2129_v10 = vmul.f32 -1.442695, %v2006_v28  ;;  %v2007_v3 = vadd.f32 %v2002_v13, %v1995_v14 }
0x1115   : > { %2347 = vpow2.f32 %v2129_v10  ;;  %v2130_v33 = vmul.f32 -1.442695, %v2007_v3 }
0x1117   : > { %2349 = vpow2.f32 %v2130_v33 }
0x111e   : > { %v2344_v15 = vpop.eup %2343 }
0x111f   : > { %v2020_v39 = vadd.f32 1.0, %v2344_v15 }
0x1120   : > { %v2346_v24 = vpop.eup %2345 }
0x1121   : > { %2351 = vrcp.f32 %v2020_v39  ;;  %v2021_v57 = vadd.f32 1.0, %v2346_v24 }
0x1122   : > { %v2348_v56 = vpop.eup %2347 }
0x1123   : > { %2353 = vrcp.f32 %v2021_v57  ;;  %v2022_v36 = vadd.f32 1.0, %v2348_v56 }
0x1124   : > { %v2350_v37 = vpop.eup %2349 }
0x1125   : > { %2355 = vrcp.f32 %v2022_v36  ;;  %v2023_v5 = vadd.f32 1.0, %v2350_v37 }
0x1127   : > { %2357 = vrcp.f32 %v2023_v5 }
0x112e   : > { %v2352_v60 = vpop.eup %2351 }
0x112f   : > { %v2032_v12 = vmul.f32 %v2352_v60, %v2004_v32 }
0x1130   : > { %v2354_v19 = vpop.eup %2353 }
0x1131   : > { %2036 = vst [vmem:[%s440_s14] sm:$0xff] %v2032_v12  ;;  %v2033_v38 = vmul.f32 %v2354_v19, %v2005_v31 }
0x1132   : > { %v2356_v45 = vpop.eup %2355 }
0x1133   : > { %2037 = vst [vmem:[%s440_s14 + $0x8] sm:$0xff] %v2033_v38  ;;  %v2034_v21 = vmul.f32 %v2356_v45, %v2006_v28 }
0x1134   : > { %v2358_v27 = vpop.eup %2357 }
0x1135   : > { %2038 = vst [vmem:[%s440_s14 + $0x10] sm:$0xff] %v2034_v21  ;;  %v2035_v46 = vmul.f32 %v2358_v27, %v2007_v3 }
0x1137   : > { %2039 = vst [vmem:[%s440_s14 + $0x18] sm:$0xff] %v2035_v46 }
0x1138 PF: > { %s23_s25 = sadd.s32 1, %s2367_s25  }
0x1139   : > { %p20_p4 = scmp.ge.s32.totalorder %s23_s25, 4  }
0x113b   :  { %22 = sbr.rel (!%p20_p4) target bundleno = 1 (0x1), region = 102 }

</bundles_post_ra>
